<compile_context>
chip_gen: v7x
topology: tpu7x:2x2x1
jax: 0.10.0
libtpu: 0.0.40
codegen_flags: <defaults>
</compile_context>

<pallas_src>
import functools

import jax
import jax.numpy as jnp
from jax import lax
from jax.experimental import pallas as pl
from jax.experimental.pallas import tpu as pltpu


def _layer_norm(v, g, b, eps):
    mu = jnp.mean(v, axis=-1, keepdims=True)
    c = v - mu
    var = jnp.mean(c * c, axis=-1, keepdims=True)
    return c * lax.rsqrt(var + eps) * g + b


# ---------------------------------------------------------------------------
# Per-(batch, layer) kernel: PE add (l==0) -> encoder layer -> out-proj (l==L-1)
# ---------------------------------------------------------------------------
def transformer_layer_kernel(
    x_ref, pe_ref,
    ln1_ref, wqkv_ref, bqkv_ref, wo_ref, bo_ref,
    ln2_ref, w1_ref, b1_ref, w2_ref, b2_ref,
    wout_ref, bout_ref,
    o_ref,                      # output block: [1, S, NC*V] f32 (lane-dense)
    h_ref,                      # persistent scratch: [T, D] f32 residual
    *, n_heads, n_codebooks, eps=1e-5):

    l = pl.program_id(1)
    n_layers = pl.num_programs(1)
    T, D = h_ref.shape
    H = n_heads
    hd = D // H
    NC = n_codebooks
    S = T // NC
    V = wout_ref.shape[-1]
    scale = 1.0 / float(hd) ** 0.5
    f32 = jnp.float32
    bf16 = jnp.bfloat16

    # ---- first layer of this batch block: init residual with PE add -------
    @pl.when(l == 0)
    def _():
        h_ref[...] = x_ref[0].astype(f32) + pe_ref[...]

    x = h_ref[...]                                            # [T, D] f32

    # ---------------- multi-head self-attention (pre-LN) -------------------
    ln1 = ln1_ref[0]                                          # [2, D]
    xn = _layer_norm(x, ln1[0:1, :], ln1[1:2, :], eps).astype(bf16)

    # fused full-width QKV projection: one [T, D] @ [D, 3D] MXU matmul
    qkv = jnp.dot(xn, wqkv_ref[0], preferred_element_type=f32) + bqkv_ref[0]
    q = qkv[:, 0 * D:1 * D] * scale                           # [T, D] f32
    k = qkv[:, 1 * D:2 * D]
    v = qkv[:, 2 * D:3 * D]

    # heads split only for the score/attend matmuls (static lane slices);
    # head merge is a lane concat feeding one full-width output projection.
    outs = []
    for h in range(H):
        q_h = q[:, h * hd:(h + 1) * hd].astype(bf16)          # [T, hd]
        k_h = k[:, h * hd:(h + 1) * hd].astype(bf16)
        v_h = v[:, h * hd:(h + 1) * hd].astype(bf16)

        s_h = jnp.einsum('qe,ke->qk', q_h, k_h,
                         preferred_element_type=f32)          # [T, T]
        s_h = s_h - jnp.max(s_h, axis=-1, keepdims=True)
        p_h = jnp.exp(s_h)
        p_h = p_h * pl.reciprocal(jnp.sum(p_h, axis=-1, keepdims=True),
                                  approx=True)
        outs.append(jnp.dot(p_h.astype(bf16), v_h,
                            preferred_element_type=f32))      # [T, hd]

    om = jnp.concatenate(outs, axis=-1).astype(bf16)          # [T, H*hd]
    attn = jnp.dot(om, wo_ref[0], preferred_element_type=f32) + bo_ref[0]

    x = x + attn                                              # residual 1

    # --------------------- feed-forward (pre-LN, ReLU) ---------------------
    ln2 = ln2_ref[0]
    xn2 = _layer_norm(x, ln2[0:1, :], ln2[1:2, :], eps).astype(bf16)
    hmid = jnp.dot(xn2, w1_ref[0], preferred_element_type=f32) + b1_ref[0]
    hmid = jnp.maximum(hmid, 0.0).astype(bf16)                # [T, 4D]
    ff = jnp.dot(hmid, w2_ref[0], preferred_element_type=f32) + b2_ref[0]

    h_ref[...] = x + ff                                       # residual 2

    # ---- last layer: per-codebook output projection, lane-dense store -----
    @pl.when(l == n_layers - 1)
    def _():
        hf = h_ref[...].reshape(NC, S, D).astype(bf16)        # [NC, S, D]
        if V % 128 == 0:
            # each codebook's store is already 128-lane aligned & unmasked
            for c in range(NC):
                o_ref[0, :, c * V:(c + 1) * V] = (
                    jnp.dot(hf[c], wout_ref[c], preferred_element_type=f32)
                    + bout_ref[c])
        else:
            # toy vocab (V < 128): pack codebooks on the lane axis so the
            # single store is unmasked
            pieces = [jnp.dot(hf[c], wout_ref[c], preferred_element_type=f32)
                      + bout_ref[c] for c in range(NC)]
            o_ref[0] = jnp.concatenate(pieces, axis=-1)       # [S, NC*V]


def _vmem_limit_bytes(T, D, NC, V):
    f32, bf16 = 4, 2
    layer_w = (3 * D * D + D * D + 8 * D * D) * bf16 + 16 * D * f32
    est = (2 * layer_w                                # double-buffered layer weights
           + NC * D * V * bf16 + NC * V * f32         # resident output projections
           + T * D * f32                              # residual scratch
           + 4 * T * D * f32                          # x block (dbl) + pe
           + 2 * (T // NC) * NC * V * f32             # output block (dbl)
           + (8 * T * D + 2 * T * T) * f32)           # activation temps headroom
    return int(min(max(2 * est, 32 << 20), 48 << 20))


def fused_forward(x, pe, p, *, n_heads, n_codebooks):
    B, T, D = x.shape
    NC = n_codebooks
    S = T // NC
    V = p["out_w"].shape[-1]
    L = p["ln1"].shape[0]

    kernel = functools.partial(transformer_layer_kernel,
                               n_heads=n_heads, n_codebooks=NC)

    def per_layer(tail):
        return pl.BlockSpec((1,) + tail,
                            lambda b, l, _t=tail: (l,) + (0,) * len(_t))

    def shared(shape):
        return pl.BlockSpec(shape, lambda b, l, _s=shape: (0,) * len(_s))

    in_specs = [
        pl.BlockSpec((1, T, D), lambda b, l: (b, 0, 0)),      # x (per batch)
        pl.BlockSpec((T, D), lambda b, l: (0, 0)),            # pe
        per_layer((2, D)),                                    # ln1
        per_layer((D, 3 * D)),                                # wqkv
        per_layer((1, 3 * D)),                                # bqkv
        per_layer((D, D)),                                    # wo
        per_layer((1, D)),                                    # bo
        per_layer((2, D)),                                    # ln2
        per_layer((D, 4 * D)),                                # w1
        per_layer((1, 4 * D)),                                # b1
        per_layer((4 * D, D)),                                # w2
        per_layer((1, D)),                                    # b2
        shared((NC, D, V)),                                   # out_w
        shared((NC, 1, V)),                                   # out_b
    ]
    out_specs = pl.BlockSpec((1, S, NC * V), lambda b, l: (b, 0, 0))

    grid_spec = pltpu.PrefetchScalarGridSpec(
        num_scalar_prefetch=0,
        grid=(B, L),
        in_specs=in_specs,
        out_specs=out_specs,
        scratch_shapes=[pltpu.VMEM((T, D), jnp.float32)],
    )

    args = (x, pe,
            p["ln1"], p["wqkv"], p["bqkv"], p["wo"], p["bo"],
            p["ln2"], p["w1"], p["b1"], p["w2"], p["b2"],
            p["out_w"], p["out_b"])

    return pl.pallas_call(
        kernel,
        out_shape=jax.ShapeDtypeStruct((B, S, NC * V), jnp.float32),
        grid_spec=grid_spec,
        compiler_params=pltpu.CompilerParams(
            dimension_semantics=("parallel", "arbitrary"),
            vmem_limit_bytes=_vmem_limit_bytes(T, D, NC, V)),
    )(*args)


# ---------------------------------------------------------------------------
# Parameter init (deterministic, synthetic) and forward glue
# ---------------------------------------------------------------------------
def init_params(key, *, n_codebooks, vocab_size, d_model, n_heads, n_layers,
                max_len):
    D, L, NC, V = d_model, n_layers, n_codebooks, vocab_size
    ks = jax.random.split(key, 12)
    scale = 0.02

    emb = scale * jax.random.normal(ks[0], (NC, V + 1, D), jnp.float32)

    # sinusoidal positional encoding, same formula as PositionalEncoding
    position = jnp.arange(max_len, dtype=jnp.float32)[:, None]
    div_term = jnp.exp(jnp.arange(0, D, 2, dtype=jnp.float32)
                       * (-jnp.log(10000.0) / D))
    pe = jnp.zeros((max_len, D), jnp.float32)
    pe = pe.at[:, 0::2].set(jnp.sin(position * div_term))
    pe = pe.at[:, 1::2].set(jnp.cos(position * div_term))

    def w(k, shape):   # matmul weights stored bf16 (MXU native)
        return (scale * jax.random.normal(k, shape, jnp.float32)).astype(jnp.bfloat16)

    def b(k, shape):   # biases / LN params stay f32
        return scale * jax.random.normal(k, shape, jnp.float32)

    ln = jnp.stack([jnp.ones((L, D), jnp.float32),
                    jnp.zeros((L, D), jnp.float32)], axis=1)     # [L, 2, D]

    return {
        "emb": emb, "pe": pe,
        "ln1": ln, "ln2": ln,
        # fused QKV weight: columns = [Wq | Wk | Wv], each head-major [H*hd]
        "wqkv": w(ks[1], (L, D, 3 * D)), "bqkv": b(ks[2], (L, 1, 3 * D)),
        # output projection consumes head-major concatenated [H*hd] rows
        "wo": w(ks[3], (L, D, D)), "bo": b(ks[4], (L, 1, D)),
        "w1": w(ks[5], (L, D, 4 * D)), "b1": b(ks[6], (L, 1, 4 * D)),
        "w2": w(ks[7], (L, 4 * D, D)), "b2": b(ks[8], (L, 1, D)),
        "out_w": w(ks[9], (NC, D, V)), "out_b": b(ks[10], (NC, 1, V)),
    }


def transformer_wrapper_forward(params, codes, *, n_heads):
    B, NC, S = codes.shape
    D = params["emb"].shape[-1]
    Vp1 = params["emb"].shape[1]
    V = params["out_w"].shape[-1]
    T = NC * S

    # single flattened embedding gather (data-dependent gather stays in XLA)
    offsets = (jnp.arange(NC, dtype=codes.dtype) * Vp1)[None, :, None]
    flat_ids = (codes + offsets).reshape(B, T)
    emb_flat = params["emb"].reshape(NC * Vp1, D)
    x = jnp.take(emb_flat, flat_ids, axis=0)                     # [B, T, D] f32

    pe = params["pe"][:T]                                        # [T, D]

    # fused PE-add + layer-streamed transformer + output projection
    logits = fused_forward(x, pe, params, n_heads=n_heads,
                           n_codebooks=NC)                       # [B, S, NC*V]

    # [B, S, NC*V] -> [B, NC, S, V] (tiny XLA reshape/transpose)
    logits = logits.reshape(B, S, NC, V).transpose(0, 2, 1, 3)
    return logits


if __name__ == "__main__":
    # Small shapes consistent with the module: batch=2, n_codebooks=4, seq=8,
    # d_model=32, n_heads=2, n_layers=2, vocab_size=64, mask_token=64.
    B, NC, S = 2, 4, 8
    D, H, L, V = 32, 2, 2, 64

    key = jax.random.PRNGKey(0)
    params = init_params(key, n_codebooks=NC, vocab_size=V, d_model=D,
                         n_heads=H, n_layers=L, max_len=NC * S)

    codes = jax.random.randint(jax.random.fold_in(key, 123),
                               (B, NC, S), 0, V + 1, dtype=jnp.int32)

    fwd = jax.jit(functools.partial(transformer_wrapper_forward, n_heads=H))
    logits = fwd(params, codes)
    logits = jax.block_until_ready(logits)
    assert logits.shape == (B, NC, S, V), logits.shape
    assert logits.dtype == jnp.float32
    assert bool(jnp.all(jnp.isfinite(logits)))
    print("KERNEL_OK")
</pallas_src>

<mosaic_0001>
module attributes {stable_mosaic.version = 11 : i64} {
  func.func @transformer_layer_kernel(%arg0: i32, %arg1: i32, %arg2: memref<1x32x32xf32, #tpu.memory_space<vmem>>, %arg3: memref<32x32xf32, #tpu.memory_space<vmem>>, %arg4: memref<1x2x32xf32, #tpu.memory_space<vmem>>, %arg5: memref<1x32x96xbf16, #tpu.memory_space<vmem>>, %arg6: memref<1x1x96xf32, #tpu.memory_space<vmem>>, %arg7: memref<1x32x32xbf16, #tpu.memory_space<vmem>>, %arg8: memref<1x1x32xf32, #tpu.memory_space<vmem>>, %arg9: memref<1x2x32xf32, #tpu.memory_space<vmem>>, %arg10: memref<1x32x128xbf16, #tpu.memory_space<vmem>>, %arg11: memref<1x1x128xf32, #tpu.memory_space<vmem>>, %arg12: memref<1x128x32xbf16, #tpu.memory_space<vmem>>, %arg13: memref<1x1x32xf32, #tpu.memory_space<vmem>>, %arg14: memref<4x32x64xbf16, #tpu.memory_space<vmem>>, %arg15: memref<4x1x64xf32, #tpu.memory_space<vmem>>, %arg16: memref<1x8x256xf32, #tpu.memory_space<vmem>>, %arg17: memref<32x32xf32, #tpu.memory_space<vmem>>) attributes {dimension_semantics = [#tpu.dimension_semantics<parallel>, #tpu.dimension_semantics<arbitrary>], iteration_bounds = array<i64: 2, 2>, scalar_prefetch = 0 : i64, scratch_operands = 1 : i64, tpu.core_type = #tpu.core_type<tc>, window_params = [{transform_indices = @transform_0, window_bounds = array<i64: 1, 32, 32>}, {pipeline_mode = #tpu.pipeline_mode<synchronous>, transform_indices = @transform_1, window_bounds = array<i64: 32, 32>}, {transform_indices = @transform_2, window_bounds = array<i64: 1, 2, 32>}, {transform_indices = @transform_3, window_bounds = array<i64: 1, 32, 96>}, {transform_indices = @transform_4, window_bounds = array<i64: 1, 1, 96>}, {transform_indices = @transform_5, window_bounds = array<i64: 1, 32, 32>}, {transform_indices = @transform_6, window_bounds = array<i64: 1, 1, 32>}, {transform_indices = @transform_7, window_bounds = array<i64: 1, 2, 32>}, {transform_indices = @transform_8, window_bounds = array<i64: 1, 32, 128>}, {transform_indices = @transform_9, window_bounds = array<i64: 1, 1, 128>}, {transform_indices = @transform_10, window_bounds = array<i64: 1, 128, 32>}, {transform_indices = @transform_11, window_bounds = array<i64: 1, 1, 32>}, {pipeline_mode = #tpu.pipeline_mode<synchronous>, transform_indices = @transform_12, window_bounds = array<i64: 4, 32, 64>}, {pipeline_mode = #tpu.pipeline_mode<synchronous>, transform_indices = @transform_13, window_bounds = array<i64: 4, 1, 64>}, {transform_indices = @transform_14, window_bounds = array<i64: 1, 8, 256>}]} {
    %c0_i32 = arith.constant 0 : i32
    %0 = arith.cmpi eq, %arg1, %c0_i32 : i32
    %1 = arith.extui %0 : i1 to i32
    %c0_i32_0 = arith.constant 0 : i32
    %2 = arith.cmpi ne, %1, %c0_i32_0 : i32
    scf.if %2 {
      %c0_58 = arith.constant 0 : index
      %c0_59 = arith.constant 0 : index
      %c0_60 = arith.constant 0 : index
      %136 = vector.load %arg2[%c0_58, %c0_59, %c0_60] : memref<1x32x32xf32, #tpu.memory_space<vmem>>, vector<1x32x32xf32>
      %137 = vector.shape_cast %136 : vector<1x32x32xf32> to vector<32x32xf32>
      %c0_61 = arith.constant 0 : index
      %c0_62 = arith.constant 0 : index
      %138 = vector.load %arg3[%c0_61, %c0_62] : memref<32x32xf32, #tpu.memory_space<vmem>>, vector<32x32xf32>
      %139 = arith.addf %137, %138 : vector<32x32xf32>
      %c0_63 = arith.constant 0 : index
      %c0_64 = arith.constant 0 : index
      %140 = vector.load %arg17[%c0_63, %c0_64] : memref<32x32xf32, #tpu.memory_space<vmem>>, vector<32x32xf32>
      tpu.vector_store %arg17[%c0_63, %c0_64], %139 {strides = array<i32>} : memref<32x32xf32, #tpu.memory_space<vmem>>, vector<32x32xf32>,
    } else {
    }
    %c0 = arith.constant 0 : index
    %c0_1 = arith.constant 0 : index
    %3 = vector.load %arg17[%c0, %c0_1] : memref<32x32xf32, #tpu.memory_space<vmem>>, vector<32x32xf32>
    %c0_2 = arith.constant 0 : index
    %c0_3 = arith.constant 0 : index
    %c0_4 = arith.constant 0 : index
    %4 = vector.load %arg4[%c0_2, %c0_3, %c0_4] : memref<1x2x32xf32, #tpu.memory_space<vmem>>, vector<1x2x32xf32>
    %5 = vector.shape_cast %4 : vector<1x2x32xf32> to vector<2x32xf32>
    %6 = vector.extract_strided_slice %5 {offsets = [0, 0], sizes = [1, 32], strides = [1, 1]} : vector<2x32xf32> to vector<1x32xf32>
    %7 = vector.extract_strided_slice %5 {offsets = [1, 0], sizes = [1, 32], strides = [1, 1]} : vector<2x32xf32> to vector<1x32xf32>
    %cst = arith.constant dense<0.000000e+00> : vector<32xf32>
    %8 = vector.multi_reduction <add>, %3, %cst [1] : vector<32x32xf32> to vector<32xf32>
    %9 = vector.shape_cast %8 : vector<32xf32> to vector<32x1xf32>
    %cst_5 = arith.constant 3.200000e+01 : f32
    %10 = vector.broadcast %cst_5 : f32 to vector<32x1xf32>
    %11 = arith.divf %9, %10 : vector<32x1xf32>
    %12 = vector.broadcast %11 : vector<32x1xf32> to vector<32x32xf32>
    %13 = arith.subf %3, %12 : vector<32x32xf32>
    %14 = arith.mulf %13, %13 : vector<32x32xf32>
    %cst_6 = arith.constant dense<0.000000e+00> : vector<32xf32>
    %15 = vector.multi_reduction <add>, %14, %cst_6 [1] : vector<32x32xf32> to vector<32xf32>
    %16 = vector.shape_cast %15 : vector<32xf32> to vector<32x1xf32>
    %cst_7 = arith.constant 3.200000e+01 : f32
    %17 = vector.broadcast %cst_7 : f32 to vector<32x1xf32>
    %18 = arith.divf %16, %17 : vector<32x1xf32>
    %cst_8 = arith.constant 9.99999974E-6 : f32
    %19 = vector.broadcast %cst_8 : f32 to vector<32x1xf32>
    %20 = arith.addf %18, %19 : vector<32x1xf32>
    %21 = math.rsqrt %20 : vector<32x1xf32>
    %22 = vector.broadcast %21 : vector<32x1xf32> to vector<32x32xf32>
    %23 = arith.mulf %13, %22 : vector<32x32xf32>
    %24 = vector.broadcast %6 : vector<1x32xf32> to vector<32x32xf32>
    %25 = arith.mulf %23, %24 : vector<32x32xf32>
    %26 = vector.broadcast %7 : vector<1x32xf32> to vector<32x32xf32>
    %27 = arith.addf %25, %26 : vector<32x32xf32>
    %28 = arith.truncf %27 : vector<32x32xf32> to vector<32x32xbf16>
    %c0_9 = arith.constant 0 : index
    %c0_10 = arith.constant 0 : index
    %c0_11 = arith.constant 0 : index
    %29 = vector.load %arg5[%c0_9, %c0_10, %c0_11] : memref<1x32x96xbf16, #tpu.memory_space<vmem>>, vector<1x32x96xbf16>
    %30 = vector.shape_cast %29 : vector<1x32x96xbf16> to vector<32x96xbf16>
    %cst_12 = arith.constant dense<0.000000e+00> : vector<32x96xf32>
    %31 = tpu.matmul %28, %30, %cst_12 {dimension_numbers = #tpu.dot_dimension_numbers<[1], [0], [0], [1], [0, 0, 1, 1], [], []>} : vector<32x32xbf16>, vector<32x96xbf16>, vector<32x96xf32> -> vector<32x96xf32>
    %c0_13 = arith.constant 0 : index
    %c0_14 = arith.constant 0 : index
    %c0_15 = arith.constant 0 : index
    %32 = vector.load %arg6[%c0_13, %c0_14, %c0_15] : memref<1x1x96xf32, #tpu.memory_space<vmem>>, vector<1x1x96xf32>
    %33 = vector.shape_cast %32 : vector<1x1x96xf32> to vector<1x96xf32>
    %34 = vector.broadcast %33 : vector<1x96xf32> to vector<32x96xf32>
    %35 = arith.addf %31, %34 : vector<32x96xf32>
    %36 = vector.extract_strided_slice %35 {offsets = [0, 0], sizes = [32, 32], strides = [1, 1]} : vector<32x96xf32> to vector<32x32xf32>
    %cst_16 = arith.constant 2.500000e-01 : f32
    %37 = vector.broadcast %cst_16 : f32 to vector<32x32xf32>
    %38 = arith.mulf %36, %37 : vector<32x32xf32>
    %39 = vector.extract_strided_slice %35 {offsets = [0, 32], sizes = [32, 32], strides = [1, 1]} : vector<32x96xf32> to vector<32x32xf32>
    %40 = vector.extract_strided_slice %35 {offsets = [0, 64], sizes = [32, 32], strides = [1, 1]} : vector<32x96xf32> to vector<32x32xf32>
    %41 = vector.extract_strided_slice %38 {offsets = [0, 0], sizes = [32, 16], strides = [1, 1]} : vector<32x32xf32> to vector<32x16xf32>
    %42 = arith.truncf %41 : vector<32x16xf32> to vector<32x16xbf16>
    %43 = vector.extract_strided_slice %39 {offsets = [0, 0], sizes = [32, 16], strides = [1, 1]} : vector<32x32xf32> to vector<32x16xf32>
    %44 = arith.truncf %43 : vector<32x16xf32> to vector<32x16xbf16>
    %45 = vector.extract_strided_slice %40 {offsets = [0, 0], sizes = [32, 16], strides = [1, 1]} : vector<32x32xf32> to vector<32x16xf32>
    %46 = arith.truncf %45 : vector<32x16xf32> to vector<32x16xbf16>
    "tpu.trace_start"() <{level = 10 : i32, message = "qe,ke->qk"}> : () -> ()
    %cst_17 = arith.constant dense<0.000000e+00> : vector<32x32xf32>
    %47 = tpu.matmul %42, %44, %cst_17 {dimension_numbers = #tpu.dot_dimension_numbers<[1], [1], [0], [0], [0, 0, 1, 0], [], []>} : vector<32x16xbf16>, vector<32x16xbf16>, vector<32x32xf32> -> vector<32x32xf32>
    "tpu.trace_stop"() : () -> ()
    %cst_18 = arith.constant dense<0xFF800000> : vector<32xf32>
    %48 = vector.multi_reduction <maximumf>, %47, %cst_18 [1] : vector<32x32xf32> to vector<32xf32>
    %49 = vector.shape_cast %48 : vector<32xf32> to vector<32x1xf32>
    %50 = vector.broadcast %49 : vector<32x1xf32> to vector<32x32xf32>
    %51 = arith.subf %47, %50 : vector<32x32xf32>
    %52 = math.exp %51 : vector<32x32xf32>
    %cst_19 = arith.constant dense<0.000000e+00> : vector<32xf32>
    %53 = vector.multi_reduction <add>, %52, %cst_19 [1] : vector<32x32xf32> to vector<32xf32>
    %54 = vector.shape_cast %53 : vector<32xf32> to vector<32x1xf32>
    %55 = tpu.reciprocal %54 {approx = true} : vector<32x1xf32> -> vector<32x1xf32>
    %56 = vector.broadcast %55 : vector<32x1xf32> to vector<32x32xf32>
    %57 = arith.mulf %52, %56 : vector<32x32xf32>
    %58 = arith.truncf %57 : vector<32x32xf32> to vector<32x32xbf16>
    %cst_20 = arith.constant dense<0.000000e+00> : vector<32x16xf32>
    %59 = tpu.matmul %58, %46, %cst_20 {dimension_numbers = #tpu.dot_dimension_numbers<[1], [0], [0], [1], [0, 0, 1, 1], [], []>} : vector<32x32xbf16>, vector<32x16xbf16>, vector<32x16xf32> -> vector<32x16xf32>
    %60 = vector.extract_strided_slice %38 {offsets = [0, 16], sizes = [32, 16], strides = [1, 1]} : vector<32x32xf32> to vector<32x16xf32>
    %61 = arith.truncf %60 : vector<32x16xf32> to vector<32x16xbf16>
    %62 = vector.extract_strided_slice %39 {offsets = [0, 16], sizes = [32, 16], strides = [1, 1]} : vector<32x32xf32> to vector<32x16xf32>
    %63 = arith.truncf %62 : vector<32x16xf32> to vector<32x16xbf16>
    %64 = vector.extract_strided_slice %40 {offsets = [0, 16], sizes = [32, 16], strides = [1, 1]} : vector<32x32xf32> to vector<32x16xf32>
    %65 = arith.truncf %64 : vector<32x16xf32> to vector<32x16xbf16>
    "tpu.trace_start"() <{level = 10 : i32, message = "qe,ke->qk"}> : () -> ()
    %cst_21 = arith.constant dense<0.000000e+00> : vector<32x32xf32>
    %66 = tpu.matmul %61, %63, %cst_21 {dimension_numbers = #tpu.dot_dimension_numbers<[1], [1], [0], [0], [0, 0, 1, 0], [], []>} : vector<32x16xbf16>, vector<32x16xbf16>, vector<32x32xf32> -> vector<32x32xf32>
    "tpu.trace_stop"() : () -> ()
    %cst_22 = arith.constant dense<0xFF800000> : vector<32xf32>
    %67 = vector.multi_reduction <maximumf>, %66, %cst_22 [1] : vector<32x32xf32> to vector<32xf32>
    %68 = vector.shape_cast %67 : vector<32xf32> to vector<32x1xf32>
    %69 = vector.broadcast %68 : vector<32x1xf32> to vector<32x32xf32>
    %70 = arith.subf %66, %69 : vector<32x32xf32>
    %71 = math.exp %70 : vector<32x32xf32>
    %cst_23 = arith.constant dense<0.000000e+00> : vector<32xf32>
    %72 = vector.multi_reduction <add>, %71, %cst_23 [1] : vector<32x32xf32> to vector<32xf32>
    %73 = vector.shape_cast %72 : vector<32xf32> to vector<32x1xf32>
    %74 = tpu.reciprocal %73 {approx = true} : vector<32x1xf32> -> vector<32x1xf32>
    %75 = vector.broadcast %74 : vector<32x1xf32> to vector<32x32xf32>
    %76 = arith.mulf %71, %75 : vector<32x32xf32>
    %77 = arith.truncf %76 : vector<32x32xf32> to vector<32x32xbf16>
    %cst_24 = arith.constant dense<0.000000e+00> : vector<32x16xf32>
    %78 = tpu.matmul %77, %65, %cst_24 {dimension_numbers = #tpu.dot_dimension_numbers<[1], [0], [0], [1], [0, 0, 1, 1], [], []>} : vector<32x32xbf16>, vector<32x16xbf16>, vector<32x16xf32> -> vector<32x16xf32>
    %79 = tpu.concatenate %59, %78 in 1 : vector<32x16xf32>, vector<32x16xf32> -> vector<32x32xf32>
    %80 = arith.truncf %79 : vector<32x32xf32> to vector<32x32xbf16>
    %c0_25 = arith.constant 0 : index
    %c0_26 = arith.constant 0 : index
    %c0_27 = arith.constant 0 : index
    %81 = vector.load %arg7[%c0_25, %c0_26, %c0_27] : memref<1x32x32xbf16, #tpu.memory_space<vmem>>, vector<1x32x32xbf16>
    %82 = vector.shape_cast %81 : vector<1x32x32xbf16> to vector<32x32xbf16>
    %cst_28 = arith.constant dense<0.000000e+00> : vector<32x32xf32>
    %83 = tpu.matmul %80, %82, %cst_28 {dimension_numbers = #tpu.dot_dimension_numbers<[1], [0], [0], [1], [0, 0, 1, 1], [], []>} : vector<32x32xbf16>, vector<32x32xbf16>, vector<32x32xf32> -> vector<32x32xf32>
    %c0_29 = arith.constant 0 : index
    %c0_30 = arith.constant 0 : index
    %c0_31 = arith.constant 0 : index
    %84 = vector.load %arg8[%c0_29, %c0_30, %c0_31] : memref<1x1x32xf32, #tpu.memory_space<vmem>>, vector<1x1x32xf32>
    %85 = vector.shape_cast %84 : vector<1x1x32xf32> to vector<1x32xf32>
    %86 = vector.broadcast %85 : vector<1x32xf32> to vector<32x32xf32>
    %87 = arith.addf %83, %86 : vector<32x32xf32>
    %88 = arith.addf %3, %87 : vector<32x32xf32>
    %c0_32 = arith.constant 0 : index
    %c0_33 = arith.constant 0 : index
    %c0_34 = arith.constant 0 : index
    %89 = vector.load %arg9[%c0_32, %c0_33, %c0_34] : memref<1x2x32xf32, #tpu.memory_space<vmem>>, vector<1x2x32xf32>
    %90 = vector.shape_cast %89 : vector<1x2x32xf32> to vector<2x32xf32>
    %91 = vector.extract_strided_slice %90 {offsets = [0, 0], sizes = [1, 32], strides = [1, 1]} : vector<2x32xf32> to vector<1x32xf32>
    %92 = vector.extract_strided_slice %90 {offsets = [1, 0], sizes = [1, 32], strides = [1, 1]} : vector<2x32xf32> to vector<1x32xf32>
    %cst_35 = arith.constant dense<0.000000e+00> : vector<32xf32>
    %93 = vector.multi_reduction <add>, %88, %cst_35 [1] : vector<32x32xf32> to vector<32xf32>
    %94 = vector.shape_cast %93 : vector<32xf32> to vector<32x1xf32>
    %cst_36 = arith.constant 3.200000e+01 : f32
    %95 = vector.broadcast %cst_36 : f32 to vector<32x1xf32>
    %96 = arith.divf %94, %95 : vector<32x1xf32>
    %97 = vector.broadcast %96 : vector<32x1xf32> to vector<32x32xf32>
    %98 = arith.subf %88, %97 : vector<32x32xf32>
    %99 = arith.mulf %98, %98 : vector<32x32xf32>
    %cst_37 = arith.constant dense<0.000000e+00> : vector<32xf32>
    %100 = vector.multi_reduction <add>, %99, %cst_37 [1] : vector<32x32xf32> to vector<32xf32>
    %101 = vector.shape_cast %100 : vector<32xf32> to vector<32x1xf32>
    %cst_38 = arith.constant 3.200000e+01 : f32
    %102 = vector.broadcast %cst_38 : f32 to vector<32x1xf32>
    %103 = arith.divf %101, %102 : vector<32x1xf32>
    %cst_39 = arith.constant 9.99999974E-6 : f32
    %104 = vector.broadcast %cst_39 : f32 to vector<32x1xf32>
    %105 = arith.addf %103, %104 : vector<32x1xf32>
    %106 = math.rsqrt %105 : vector<32x1xf32>
    %107 = vector.broadcast %106 : vector<32x1xf32> to vector<32x32xf32>
    %108 = arith.mulf %98, %107 : vector<32x32xf32>
    %109 = vector.broadcast %91 : vector<1x32xf32> to vector<32x32xf32>
    %110 = arith.mulf %108, %109 : vector<32x32xf32>
    %111 = vector.broadcast %92 : vector<1x32xf32> to vector<32x32xf32>
    %112 = arith.addf %110, %111 : vector<32x32xf32>
    %113 = arith.truncf %112 : vector<32x32xf32> to vector<32x32xbf16>
    %c0_40 = arith.constant 0 : index
    %c0_41 = arith.constant 0 : index
    %c0_42 = arith.constant 0 : index
    %114 = vector.load %arg10[%c0_40, %c0_41, %c0_42] : memref<1x32x128xbf16, #tpu.memory_space<vmem>>, vector<1x32x128xbf16>
    %115 = vector.shape_cast %114 : vector<1x32x128xbf16> to vector<32x128xbf16>
    %cst_43 = arith.constant dense<0.000000e+00> : vector<32x128xf32>
    %116 = tpu.matmul %113, %115, %cst_43 {dimension_numbers = #tpu.dot_dimension_numbers<[1], [0], [0], [1], [0, 0, 1, 1], [], []>} : vector<32x32xbf16>, vector<32x128xbf16>, vector<32x128xf32> -> vector<32x128xf32>
    %c0_44 = arith.constant 0 : index
    %c0_45 = arith.constant 0 : index
    %c0_46 = arith.constant 0 : index
    %117 = vector.load %arg11[%c0_44, %c0_45, %c0_46] : memref<1x1x128xf32, #tpu.memory_space<vmem>>, vector<1x1x128xf32>
    %118 = vector.shape_cast %117 : vector<1x1x128xf32> to vector<1x128xf32>
    %119 = vector.broadcast %118 : vector<1x128xf32> to vector<32x128xf32>
    %120 = arith.addf %116, %119 : vector<32x128xf32>
    %cst_47 = arith.constant 0.000000e+00 : f32
    %121 = vector.broadcast %cst_47 : f32 to vector<32x128xf32>
    %122 = arith.maximumf %120, %121 : vector<32x128xf32>
    %123 = arith.truncf %122 : vector<32x128xf32> to vector<32x128xbf16>
    %c0_48 = arith.constant 0 : index
    %c0_49 = arith.constant 0 : index
    %c0_50 = arith.constant 0 : index
    %124 = vector.load %arg12[%c0_48, %c0_49, %c0_50] : memref<1x128x32xbf16, #tpu.memory_space<vmem>>, vector<1x128x32xbf16>
    %125 = vector.shape_cast %124 : vector<1x128x32xbf16> to vector<128x32xbf16>
    %cst_51 = arith.constant dense<0.000000e+00> : vector<32x32xf32>
    %126 = tpu.matmul %123, %125, %cst_51 {dimension_numbers = #tpu.dot_dimension_numbers<[1], [0], [0], [1], [0, 0, 1, 1], [], []>} : vector<32x128xbf16>, vector<128x32xbf16>, vector<32x32xf32> -> vector<32x32xf32>
    %c0_52 = arith.constant 0 : index
    %c0_53 = arith.constant 0 : index
    %c0_54 = arith.constant 0 : index
    %127 = vector.load %arg13[%c0_52, %c0_53, %c0_54] : memref<1x1x32xf32, #tpu.memory_space<vmem>>, vector<1x1x32xf32>
    %128 = vector.shape_cast %127 : vector<1x1x32xf32> to vector<1x32xf32>
    %129 = vector.broadcast %128 : vector<1x32xf32> to vector<32x32xf32>
    %130 = arith.addf %126, %129 : vector<32x32xf32>
    %131 = arith.addf %88, %130 : vector<32x32xf32>
    %c0_55 = arith.constant 0 : index
    %c0_56 = arith.constant 0 : index
    %132 = vector.load %arg17[%c0_55, %c0_56] : memref<32x32xf32, #tpu.memory_space<vmem>>, vector<32x32xf32>
    tpu.vector_store %arg17[%c0_55, %c0_56], %131 {strides = array<i32>} : memref<32x32xf32, #tpu.memory_space<vmem>>, vector<32x32xf32>,
    %c1_i32 = arith.constant 1 : i32
    %133 = arith.cmpi eq, %arg1, %c1_i32 : i32
    %134 = arith.extui %133 : i1 to i32
    %c0_i32_57 = arith.constant 0 : i32
    %135 = arith.cmpi ne, %134, %c0_i32_57 : i32
    scf.if %135 {
      %c0_58 = arith.constant 0 : index
      %c0_59 = arith.constant 0 : index
      %136 = vector.load %arg17[%c0_58, %c0_59] : memref<32x32xf32, #tpu.memory_space<vmem>>, vector<32x32xf32>
      %137 = vector.shape_cast %136 : vector<32x32xf32> to vector<4x8x32xf32>
      %138 = arith.truncf %137 : vector<4x8x32xf32> to vector<4x8x32xbf16>
      %139 = vector.extract_strided_slice %138 {offsets = [0, 0, 0], sizes = [1, 8, 32], strides = [1, 1, 1]} : vector<4x8x32xbf16> to vector<1x8x32xbf16>
      %140 = vector.shape_cast %139 : vector<1x8x32xbf16> to vector<8x32xbf16>
      %c0_60 = arith.constant 0 : index
      %c0_61 = arith.constant 0 : index
      %c0_62 = arith.constant 0 : index
      %141 = vector.load %arg14[%c0_60, %c0_61, %c0_62] : memref<4x32x64xbf16, #tpu.memory_space<vmem>>, vector<1x32x64xbf16>
      %142 = vector.shape_cast %141 : vector<1x32x64xbf16> to vector<32x64xbf16>
      %cst_63 = arith.constant dense<0.000000e+00> : vector<8x64xf32>
      %143 = tpu.matmul %140, %142, %cst_63 {dimension_numbers = #tpu.dot_dimension_numbers<[1], [0], [0], [1], [0, 0, 1, 1], [], []>} : vector<8x32xbf16>, vector<32x64xbf16>, vector<8x64xf32> -> vector<8x64xf32>
      %c0_64 = arith.constant 0 : index
      %c0_65 = arith.constant 0 : index
      %c0_66 = arith.constant 0 : index
      %144 = vector.load %arg15[%c0_64, %c0_65, %c0_66] : memref<4x1x64xf32, #tpu.memory_space<vmem>>, vector<1x1x64xf32>
      %145 = vector.shape_cast %144 : vector<1x1x64xf32> to vector<1x64xf32>
      %146 = vector.broadcast %145 : vector<1x64xf32> to vector<8x64xf32>
      %147 = arith.addf %143, %146 : vector<8x64xf32>
      %148 = vector.extract_strided_slice %138 {offsets = [1, 0, 0], sizes = [1, 8, 32], strides = [1, 1, 1]} : vector<4x8x32xbf16> to vector<1x8x32xbf16>
      %149 = vector.shape_cast %148 : vector<1x8x32xbf16> to vector<8x32xbf16>
      %c1 = arith.constant 1 : index
      %c0_67 = arith.constant 0 : index
      %c0_68 = arith.constant 0 : index
      %150 = vector.load %arg14[%c1, %c0_67, %c0_68] : memref<4x32x64xbf16, #tpu.memory_space<vmem>>, vector<1x32x64xbf16>
      %151 = vector.shape_cast %150 : vector<1x32x64xbf16> to vector<32x64xbf16>
      %cst_69 = arith.constant dense<0.000000e+00> : vector<8x64xf32>
      %152 = tpu.matmul %149, %151, %cst_69 {dimension_numbers = #tpu.dot_dimension_numbers<[1], [0], [0], [1], [0, 0, 1, 1], [], []>} : vector<8x32xbf16>, vector<32x64xbf16>, vector<8x64xf32> -> vector<8x64xf32>
      %c1_70 = arith.constant 1 : index
      %c0_71 = arith.constant 0 : index
      %c0_72 = arith.constant 0 : index
      %153 = vector.load %arg15[%c1_70, %c0_71, %c0_72] : memref<4x1x64xf32, #tpu.memory_space<vmem>>, vector<1x1x64xf32>
      %154 = vector.shape_cast %153 : vector<1x1x64xf32> to vector<1x64xf32>
      %155 = vector.broadcast %154 : vector<1x64xf32> to vector<8x64xf32>
      %156 = arith.addf %152, %155 : vector<8x64xf32>
      %157 = vector.extract_strided_slice %138 {offsets = [2, 0, 0], sizes = [1, 8, 32], strides = [1, 1, 1]} : vector<4x8x32xbf16> to vector<1x8x32xbf16>
      %158 = vector.shape_cast %157 : vector<1x8x32xbf16> to vector<8x32xbf16>
      %c2 = arith.constant 2 : index
      %c0_73 = arith.constant 0 : index
      %c0_74 = arith.constant 0 : index
      %159 = vector.load %arg14[%c2, %c0_73, %c0_74] : memref<4x32x64xbf16, #tpu.memory_space<vmem>>, vector<1x32x64xbf16>
      %160 = vector.shape_cast %159 : vector<1x32x64xbf16> to vector<32x64xbf16>
      %cst_75 = arith.constant dense<0.000000e+00> : vector<8x64xf32>
      %161 = tpu.matmul %158, %160, %cst_75 {dimension_numbers = #tpu.dot_dimension_numbers<[1], [0], [0], [1], [0, 0, 1, 1], [], []>} : vector<8x32xbf16>, vector<32x64xbf16>, vector<8x64xf32> -> vector<8x64xf32>
      %c2_76 = arith.constant 2 : index
      %c0_77 = arith.constant 0 : index
      %c0_78 = arith.constant 0 : index
      %162 = vector.load %arg15[%c2_76, %c0_77, %c0_78] : memref<4x1x64xf32, #tpu.memory_space<vmem>>, vector<1x1x64xf32>
      %163 = vector.shape_cast %162 : vector<1x1x64xf32> to vector<1x64xf32>
      %164 = vector.broadcast %163 : vector<1x64xf32> to vector<8x64xf32>
      %165 = arith.addf %161, %164 : vector<8x64xf32>
      %166 = vector.extract_strided_slice %138 {offsets = [3, 0, 0], sizes = [1, 8, 32], strides = [1, 1, 1]} : vector<4x8x32xbf16> to vector<1x8x32xbf16>
      %167 = vector.shape_cast %166 : vector<1x8x32xbf16> to vector<8x32xbf16>
      %c3 = arith.constant 3 : index
      %c0_79 = arith.constant 0 : index
      %c0_80 = arith.constant 0 : index
      %168 = vector.load %arg14[%c3, %c0_79, %c0_80] : memref<4x32x64xbf16, #tpu.memory_space<vmem>>, vector<1x32x64xbf16>
      %169 = vector.shape_cast %168 : vector<1x32x64xbf16> to vector<32x64xbf16>
      %cst_81 = arith.constant dense<0.000000e+00> : vector<8x64xf32>
      %170 = tpu.matmul %167, %169, %cst_81 {dimension_numbers = #tpu.dot_dimension_numbers<[1], [0], [0], [1], [0, 0, 1, 1], [], []>} : vector<8x32xbf16>, vector<32x64xbf16>, vector<8x64xf32> -> vector<8x64xf32>
      %c3_82 = arith.constant 3 : index
      %c0_83 = arith.constant 0 : index
      %c0_84 = arith.constant 0 : index
      %171 = vector.load %arg15[%c3_82, %c0_83, %c0_84] : memref<4x1x64xf32, #tpu.memory_space<vmem>>, vector<1x1x64xf32>
      %172 = vector.shape_cast %171 : vector<1x1x64xf32> to vector<1x64xf32>
      %173 = vector.broadcast %172 : vector<1x64xf32> to vector<8x64xf32>
      %174 = arith.addf %170, %173 : vector<8x64xf32>
      %175 = tpu.concatenate %147, %156, %165, %174 in 1 : vector<8x64xf32>, vector<8x64xf32>, vector<8x64xf32>, vector<8x64xf32> -> vector<8x256xf32>
      %c0_85 = arith.constant 0 : index
      %c0_86 = arith.constant 0 : index
      %c0_87 = arith.constant 0 : index
      %176 = vector.load %arg16[%c0_85, %c0_86, %c0_87] : memref<1x8x256xf32, #tpu.memory_space<vmem>>, vector<1x8x256xf32>
      %177 = vector.shape_cast %176 : vector<1x8x256xf32> to vector<8x256xf32>
      %178 = vector.shape_cast %175 : vector<8x256xf32> to vector<1x8x256xf32>
      tpu.vector_store %arg16[%c0_85, %c0_86, %c0_87], %178 {strides = array<i32>} : memref<1x8x256xf32, #tpu.memory_space<vmem>>, vector<1x8x256xf32>,
    } else {
    }
    return
  }
  func.func @transform_0(%arg0: i32, %arg1: i32) -> (i32, i32, i32) {
    %c0_i32 = arith.constant 0 : i32
    %c0_i32_0 = arith.constant 0 : i32
    %c0_i32_1 = arith.constant 0 : i32
    return %arg0, %c0_i32, %c0_i32_0 : i32, i32, i32
  }
  func.func @transform_1(%arg0: i32, %arg1: i32) -> (i32, i32) {
    %c0_i32 = arith.constant 0 : i32
    %c0_i32_0 = arith.constant 0 : i32
    %c0_i32_1 = arith.constant 0 : i32
    return %c0_i32, %c0_i32_0 : i32, i32
  }
  func.func @transform_2(%arg0: i32, %arg1: i32) -> (i32, i32, i32) {
    %c0_i32 = arith.constant 0 : i32
    %c0_i32_0 = arith.constant 0 : i32
    %c0_i32_1 = arith.constant 0 : i32
    return %arg1, %c0_i32, %c0_i32_0 : i32, i32, i32
  }
  func.func @transform_3(%arg0: i32, %arg1: i32) -> (i32, i32, i32) {
    %c0_i32 = arith.constant 0 : i32
    %c0_i32_0 = arith.constant 0 : i32
    %c0_i32_1 = arith.constant 0 : i32
    return %arg1, %c0_i32, %c0_i32_0 : i32, i32, i32
  }
  func.func @transform_4(%arg0: i32, %arg1: i32) -> (i32, i32, i32) {
    %c0_i32 = arith.constant 0 : i32
    %c0_i32_0 = arith.constant 0 : i32
    %c0_i32_1 = arith.constant 0 : i32
    return %arg1, %c0_i32, %c0_i32_0 : i32, i32, i32
  }
  func.func @transform_5(%arg0: i32, %arg1: i32) -> (i32, i32, i32) {
    %c0_i32 = arith.constant 0 : i32
    %c0_i32_0 = arith.constant 0 : i32
    %c0_i32_1 = arith.constant 0 : i32
    return %arg1, %c0_i32, %c0_i32_0 : i32, i32, i32
  }
  func.func @transform_6(%arg0: i32, %arg1: i32) -> (i32, i32, i32) {
    %c0_i32 = arith.constant 0 : i32
    %c0_i32_0 = arith.constant 0 : i32
    %c0_i32_1 = arith.constant 0 : i32
    return %arg1, %c0_i32, %c0_i32_0 : i32, i32, i32
  }
  func.func @transform_7(%arg0: i32, %arg1: i32) -> (i32, i32, i32) {
    %c0_i32 = arith.constant 0 : i32
    %c0_i32_0 = arith.constant 0 : i32
    %c0_i32_1 = arith.constant 0 : i32
    return %arg1, %c0_i32, %c0_i32_0 : i32, i32, i32
  }
  func.func @transform_8(%arg0: i32, %arg1: i32) -> (i32, i32, i32) {
    %c0_i32 = arith.constant 0 : i32
    %c0_i32_0 = arith.constant 0 : i32
    %c0_i32_1 = arith.constant 0 : i32
    return %arg1, %c0_i32, %c0_i32_0 : i32, i32, i32
  }
  func.func @transform_9(%arg0: i32, %arg1: i32) -> (i32, i32, i32) {
    %c0_i32 = arith.constant 0 : i32
    %c0_i32_0 = arith.constant 0 : i32
    %c0_i32_1 = arith.constant 0 : i32
    return %arg1, %c0_i32, %c0_i32_0 : i32, i32, i32
  }
  func.func @transform_10(%arg0: i32, %arg1: i32) -> (i32, i32, i32) {
    %c0_i32 = arith.constant 0 : i32
    %c0_i32_0 = arith.constant 0 : i32
    %c0_i32_1 = arith.constant 0 : i32
    return %arg1, %c0_i32, %c0_i32_0 : i32, i32, i32
  }
  func.func @transform_11(%arg0: i32, %arg1: i32) -> (i32, i32, i32) {
    %c0_i32 = arith.constant 0 : i32
    %c0_i32_0 = arith.constant 0 : i32
    %c0_i32_1 = arith.constant 0 : i32
    return %arg1, %c0_i32, %c0_i32_0 : i32, i32, i32
  }
  func.func @transform_12(%arg0: i32, %arg1: i32) -> (i32, i32, i32) {
    %c0_i32 = arith.constant 0 : i32
    %c0_i32_0 = arith.constant 0 : i32
    %c0_i32_1 = arith.constant 0 : i32
    %c0_i32_2 = arith.constant 0 : i32
    return %c0_i32, %c0_i32_0, %c0_i32_1 : i32, i32, i32
  }
  func.func @transform_13(%arg0: i32, %arg1: i32) -> (i32, i32, i32) {
    %c0_i32 = arith.constant 0 : i32
    %c0_i32_0 = arith.constant 0 : i32
    %c0_i32_1 = arith.constant 0 : i32
    %c0_i32_2 = arith.constant 0 : i32
    return %c0_i32, %c0_i32_0, %c0_i32_1 : i32, i32, i32
  }
  func.func @transform_14(%arg0: i32, %arg1: i32) -> (i32, i32, i32) {
    %c0_i32 = arith.constant 0 : i32
    %c0_i32_0 = arith.constant 0 : i32
    %c0_i32_1 = arith.constant 0 : i32
    return %arg0, %c0_i32, %c0_i32_0 : i32, i32, i32
  }
}

</mosaic_0001>

<bundles_post_ra>
// kernel: transformer_wrapper_forward.1
= control target key start
LH: loop header
LB: loop body
LE: loop exit
PB: predicated region body
PF: predicated region fallthrough
CT: control target
= control target key end

     0   :  { %s2551_s29 = smov 0   ;;  %s2553_s30 = smov 0   ;;  %s2910_s0 = inlined_call_operand.vmem [shape: f32[2,32,32], index: 0, kind: input, shape index: {}]   ;;  %s2911_s1 = inlined_call_operand.vmem [shape: f32[32,32], index: 1, kind: input, shape index: {}]   ;;  %s2912_s2 = inlined_call_operand.vmem [shape: f32[2,2,32], index: 2, kind: input, shape index: {}]   ;;  %s2913_s3 = inlined_call_operand.vmem [shape: bf16[2,32,96], index: 3, kind: input, shape index: {}]   ;;  %s2914_s4 = inlined_call_operand.vmem [shape: f32[2,1,96], index: 4, kind: input, shape index: {}]   ;;  %s2915_s5 = inlined_call_operand.vmem [shape: bf16[2,32,32], index: 5, kind: input, shape index: {}]   ;;  %s2916_s6 = inlined_call_operand.vmem [shape: f32[2,1,32], index: 6, kind: input, shape index: {}]   ;;  %s2917_s7 = inlined_call_operand.vmem [shape: f32[2,2,32], index: 7, kind: input, shape index: {}]   ;;  %s2918_s8 = inlined_call_operand.vmem [shape: bf16[2,32,128], index: 8, kind: input, shape index: {}]   ;;  %s2919_s9 = inlined_call_operand.vmem [shape: f32[2,1,128], index: 9, kind: input, shape index: {}]   ;;  %s2920_s10 = inlined_call_operand.vmem [shape: bf16[2,128,32], index: 10, kind: input, shape index: {}]   ;;  %s2921_s11 = inlined_call_operand.vmem [shape: f32[2,1,32], index: 11, kind: input, shape index: {}]   ;;  %s2922_s12 = inlined_call_operand.vmem [shape: bf16[4,32,64], index: 12, kind: input, shape index: {}]   ;;  %s2923_s13 = inlined_call_operand.vmem [shape: f32[4,1,64], index: 13, kind: input, shape index: {}]   ;;  %s2924_s14 = inlined_call_operand.vmem [shape: f32[2,8,256], index: 14, kind: output, shape index: {}]  }
   0x1   :  { %2932 = sst [smem:[#allocation9_spill]] %s2910_s0  ;;  %s2555_s15 = smov 0  }
   0x2   :  { %2933 = sst [smem:[#allocation10_spill]] %s2911_s1  ;;  %s2557_s16 = smov 0  }
   0x3   :  { %2934 = sst [smem:[#allocation11_spill]] %s2912_s2  ;;  %s2559_s17 = smov 0  }
   0x4   :  { %2935 = sst [smem:[#allocation12_spill]] %s2913_s3 }
   0x5   :  { %2936 = sst [smem:[#allocation13_spill]] %s2915_s5 }
   0x6   :  { %2937 = sst [smem:[#allocation14_spill]] %s2922_s12 }
   0x7   :  { %2938 = sst [smem:[#allocation15_spill]] %s2923_s13 }
   0x8 LB: > { %2939 = sst [smem:[#allocation3_spill]] %s2449_s29  ;;  %s33_s18 = sadd.s32 1, %s2457_s15  ;;  %s2465_s17 = sphi %s2559_s17, %s24_s17   ;;  %s2461_s16 = sphi %s2557_s16, %s2961_s16   ;;  %s2457_s15 = sphi %s2555_s15, %s2960_s15   ;;  %s2453_s30 = sphi %s2553_s30, %s2959_s30   ;;  %s2449_s29 = sphi %s2551_s29, %s2958_s29  }
   0x9   : > { %2940 = sst [smem:[#allocation4_spill]] %s2457_s15  ;;  %s36_s19 = sadd.s32 1, %s2461_s16 }
   0xa   : > { %2941 = sst [smem:[#allocation5_spill]] %s2461_s16  ;;  %p34_p0 = scmp.ge.s32.totalorder %s33_s18, 2 }
   0xb   : > { %2942 = sst [smem:[#allocation6_spill]] %s2465_s17  ;;  %p2048_p1 = scmp.ge.s32.totalorder %s2465_s17, 1 }
   0xc   : > { %p514_p2 = scmp.lt.s32.totalorder %s2465_s17, 5  ;;  %s2963_s18 = smov (%p34_p0, %s33_s18), 0 }
   0xd   : > { %2943 = sst [smem:[#allocation7_spill]] %s2963_s18  ;;  %s2965_s19 = smov (!%p34_p0, %s36_s19), %s2461_s16 }
   0xe   : > { %p515_p3 = pnand %p2048_p1, %p514_p2  ;;  %p38_p4 = scmp.ge.s32.totalorder %s2965_s19, 2 }
   0xf   : > { %p600_p5 = scmp.lt.s32.totalorder (!%p515_p3), %s2453_s30, 1  ;;  %p605_p6 = scmp.lt.s32.totalorder (!%p515_p3), %s2449_s29, 1 }
  0x10   : > { %s2967_s19 = smov (%p38_p4, %s2965_s19), 0  ;;  %518 = sbr.rel (%p515_p3) target bundleno = 3499 (0xdab), region = 76 }
  0x11   : > { %2944 = sst [smem:[#allocation8_spill]] %s2967_s19  ;;  %s2945_s0 = sld [smem:[#allocation9_spill]] (!%p515_p3) }
  0x12   : > { %s2946_s2 = sld [smem:[#allocation11_spill]] (!%p515_p3)  ;;  %s2947_s3 = sld [smem:[#allocation12_spill]] (!%p515_p3) }
  0x13   : > { %s2948_s5 = sld [smem:[#allocation13_spill]] (!%p515_p3) }
  0x17   : > { %s2969_s30 = smov (!%p600_p5, %s2453_s30), 1 }
  0x18   : > { %s2585_s20 = scalar_select %p605_p6, %s2449_s29, 1 }
  0x19   : > { %s2130_s21 = sshll.u32 %s2969_s30, 5  ;;  %s2135_s22 = sshll.u32 %s2969_s30, 4 }
  0x1a   : > { %s604_s25 = scalar_lea.vmem %s2945_s0, %s2130_s21  ;;  %s2051_s26 = sshll.u32 %s2585_s20, 1 }
  0x1b   : > { %s2594_s19 = scalar_lea.vmem %s2946_s2, %s2051_s26  ;;  %s2131_s18 = sshll.u32 %s2585_s20, 4 }
  0x1c   : > { %s2600_s17 = scalar_lea.vmem %s2947_s3, %s2131_s18  ;;  %s2609_s21 = scalar_lea.vmem %s2948_s5, %s2131_s18 }
  0x1d   : > { %s2618_s2 = scalar_lea.vmem %s2917_s7, %s2051_s26  ;;  %s2623_s3 = scalar_lea.vmem %s2918_s8, %s2131_s18 }
  0x1e   : > { %s636_s1 = scalar_lea.vmem %s2919_s9, %s2585_s20  ;;  %s2134_s29 = sshll.u32 %s2585_s20, 6 }
  0x1f   : > { %s2633_s23 = scalar_lea.vmem %s2920_s10, %s2134_s29  ;;  %s644_s0 = scalar_lea.vmem %s2921_s11, %s2585_s20 }
  0x20   : > { %s2642_s15 = scalar_lea.vmem %s2924_s14, %s2135_s22  ;;  %s2949_s18 = sld [smem:[#allocation3_spill]] }
  0x26   : > { %p2063_p7 = scmp.ne.s32.totalorder %s2949_s18, 0 }
  0x27   : > { %v655_v0 = vld [vmem:[%s604_s25] sm:$0xff] (!%p2063_p7)  ;;  %s2950_s13 = sld [smem:[#allocation10_spill]] (!%p2063_p7)  ;;  %vm667_vm0 = vcmask (!%p2063_p7), 261120   ;;  %v656_v2 = vld [vmem:[%s604_s25 + $0x8] sm:$0xff] (!%p2063_p7)  ;;  %v657_v5 = vld [vmem:[%s604_s25 + $0x10] sm:$0xff] (!%p2063_p7) }
  0x28   : > { %654 = sbr.rel (%p2063_p7) target bundleno = 50 (0x32), region = 80  ;;  %v658_v9 = vld [vmem:[%s604_s25 + $0x18] sm:$0xff] (!%p2063_p7) }
  0x2d   : > { %v659_v1 = vld [vmem:[%s2950_s13] sm:$0xff] (!%p2063_p7)  ;;  %v660_v4 = vld [vmem:[%s2950_s13 + $0x8] sm:$0xff] (!%p2063_p7)  ;;  %v661_v6 = vld [vmem:[%s2950_s13 + $0x10] sm:$0xff] (!%p2063_p7) }
  0x2e   : > { %v663_v3 = vadd.f32 (!%p2063_p7), %v659_v1, %v655_v0  ;;  %v664_v7 = vadd.f32 (!%p2063_p7), %v660_v4, %v656_v2  ;;  %v665_v8 = vadd.f32 (!%p2063_p7), %v661_v6, %v657_v5  ;;  %v662_v10 = vld [vmem:[%s2950_s13 + $0x18] sm:$0xff] (!%p2063_p7) }
  0x2f   : > { %v666_v11 = vadd.f32 %v662_v10, %v658_v9 }
  0x30   : > { %668 = vst.msk [vmem:[#allocation2] sm:$0xff] %vm667_vm0, %v663_v3  ;;  %669 = vst.msk [vmem:[#allocation2 + $0x8] sm:$0xff] %vm667_vm0, %v664_v7 }
  0x31   : > { %670 = vst.msk [vmem:[#allocation2 + $0x10] sm:$0xff] %vm667_vm0, %v665_v8  ;;  %671 = vst.msk [vmem:[#allocation2 + $0x18] sm:$0xff] %vm667_vm0, %v666_v11 }
  0x32 PF: > { %vm677_vm1 = vcmask 261120   ;;  %v2357_v40 = vld [vmem:[%s2600_s17] sm:$0xff]   ;;  %v2358_v41 = vld [vmem:[%s2600_s17 + $0x8] sm:$0xff]   ;;  %v731_v47 = vlaneseq  ;;  %s2951_s25 = scalar_lea.vmem %s2914_s4, %s2585_s20  ;;  %s2467_s26 = smov 96   ;;  %vm841_vm2 = vcmask 130048  }
  0x33   : > { %2186 = vmatprep.subr.bf16.mxu0 %v2357_v40  ;;  %v676_v57 = vld [vmem:[%s2594_s19] sm:$0x3]  ;;  %s2468_s28 = smov 64   ;;  %s2469_s18 = smov 80  }
  0x34   : > { %2187 = vmatpush3.bf16.msra.mxu0 %v2357_v40  ;;  %v2683_v53 = vshrl.u32 %v731_v47, 7  ;;  %s2470_s16 = smov 112   ;;  %s2471_s12 = smov 48  }
  0x35   : > { %2188 = vmatprep.subr.bf16.mxu0 %v2358_v41  ;;  %s2472_s5 = smov 16   ;;  %s2952_s27 = scalar_lea.vmem %s2916_s6, %s2585_s20 }
  0x36   : > { %v733_v56 = vsub.s32 0, %v2683_v53  ;;  %v741_v61 = vsub.s32 1, %v2683_v53  ;;  %s2953_s20 = sld [smem:[#allocation3_spill]] }
  0x37   : > { %v2657_v12 = vld [vmem:[#allocation2] sm:$0xff]  ;;  %v2661_v14 = vld [vmem:[#allocation2 + $0x8] sm:$0xff] }
  0x38   : > { %v2659_v13 = vld [vmem:[#allocation2 + $0x10] sm:$0xff]  ;;  %v678_v15 = vsel %vm677_vm1, %v2657_v12, 0.0  ;;  %v2667_v17 = vld [vmem:[#allocation2 + $0x18] sm:$0xff]  ;;  %v681_v18 = vsel %vm677_vm1, %v2661_v14, 0.0  ;;  %2189 = vmatpush3.bf16.msra.mxu0 %v2358_v41  ;;  %v734_v60 = vrot.slane %v676_v57, %v733_v56  ;;  %v742_v2 = vrot.slane %v676_v57, %v741_v61 }
  0x39   : > { %v684_v16 = vsel %vm677_vm1, %v2659_v13, 0.0  ;;  %679 = vadd.xlane.f32.xlu0 %v678_v15  ;;  %v687_v19 = vsel %vm677_vm1, %v2667_v17, 0.0 }
  0x3a   : > { %685 = vadd.xlane.f32.xlu1 %v684_v16 }
  0x3c   : > { %p2096_p8 = scmp.ne.s32.totalorder %s2953_s20, 1 }
  0x3d   : > { %682 = vadd.xlane.f32.xlu0 %v681_v18  ;;  %s2954_s22 = sld [smem:[#allocation14_spill]] (!%p2096_p8)  ;;  %vm2474_vm3 = vmmov (!%p2096_p8), 0   ;;  %s2955_s29 = sld [smem:[#allocation15_spill]] (!%p2096_p8)  ;;  %vm1865_vm4 = vcmask (!%p2096_p8), 523264  }
  0x3e   : > { %688 = vadd.xlane.f32.xlu1 %v687_v19  ;;  %v2064_v19 = vld [vmem:[%s2951_s25] ss:$0 sm:$0xff] }
  0x43   : > { %s2956_s20 = smov (!%p2096_p8), %s2955_s29 }
  0xc6   : > { %v680_v20 = vpop.xlane.xlu0 %679 }
  0xc7   : > { %v686_v21 = vpop.xlane.xlu1 %685  ;;  %v691_v22 = vmul.f32 0.03125, %v680_v20 }
  0xc8   : > { %v693_v23 = vmul.f32 0.03125, %v686_v21 }
  0xc9   : > { %v695_v24 = vsub.f32 %v2657_v12, %v691_v22 }
  0xca   : > { %v697_v25 = vsub.f32 %v2659_v13, %v693_v23  ;;  %v683_v26 = vpop.xlane.xlu0 %682 }
  0xcb   : > { %v689_v27 = vpop.xlane.xlu1 %688  ;;  %v692_v28 = vmul.f32 0.03125, %v683_v26  ;;  %v699_v30 = vmul.f32 %v695_v24, %v695_v24 }
  0xcc   : > { %v694_v29 = vmul.f32 0.03125, %v689_v27  ;;  %v701_v31 = vmul.f32 %v697_v25, %v697_v25 }
  0xcd   : > { %v696_v32 = vsub.f32 %v2661_v14, %v692_v28  ;;  %v703_v34 = vsel %vm677_vm1, %v699_v30, 0.0 }
  0xce   : > { %v698_v33 = vsub.f32 %v2667_v17, %v694_v29  ;;  %704 = vadd.xlane.f32.xlu0 %v703_v34  ;;  %v709_v35 = vsel %vm677_vm1, %v701_v31, 0.0 }
  0xcf   : > { %v700_v36 = vmul.f32 %v696_v32, %v696_v32 }
  0xd0   : > { %v702_v37 = vmul.f32 %v698_v33, %v698_v33 }
  0xd1   : > { %v706_v38 = vsel %vm677_vm1, %v700_v36, 0.0 }
  0xd2   : > { %710 = vadd.xlane.f32.xlu0 %v709_v35  ;;  %707 = vadd.xlane.f32.xlu1 %v706_v38  ;;  %v712_v39 = vsel %vm677_vm1, %v702_v37, 0.0 }
  0xd6   : > { %713 = vadd.xlane.f32.xlu1 %v712_v39 }
 0x15b   : > { %v705_v42 = vpop.xlane.xlu0 %704 }
 0x15c   : > { %v715_v43 = vmul.f32 0.03125, %v705_v42 }
 0x15e   : > { %v719_v44 = vadd.f32 1e-05, %v715_v43 }
 0x15f   : > { %v708_v45 = vpop.xlane.xlu1 %707  ;;  %v711_v46 = vpop.xlane.xlu0 %710 }
 0x160   : > { %2371 = vrsqrt.f32 %v719_v44  ;;  %v716_v48 = vmul.f32 0.03125, %v708_v45  ;;  %v717_v49 = vmul.f32 0.03125, %v711_v46 }
 0x162   : > { %v720_v50 = vadd.f32 1e-05, %v716_v48  ;;  %v721_v51 = vadd.f32 1e-05, %v717_v49 }
 0x163   : > { %v714_v52 = vpop.xlane.xlu1 %713 }
 0x164   : > { %2373 = vrsqrt.f32 %v720_v50  ;;  %v718_v54 = vmul.f32 0.03125, %v714_v52 }
 0x165   : > { %2375 = vrsqrt.f32 %v721_v51 }
 0x166   : > { %v722_v55 = vadd.f32 1e-05, %v718_v54 }
 0x168   : > { %2377 = vrsqrt.f32 %v722_v55 }
 0x16a   : > { %v2372_v58 = vpop.eup %2371 }
 0x16b   : > { %v727_v59 = vmul.f32 %v2372_v58, %v695_v24 }
 0x16d   : > { %v735_v1 = vmul.f32 %v734_v60, %v727_v59 }
 0x16e   : > { %v2374_v62 = vpop.eup %2373 }
 0x16f   : > { %v2376_v63 = vpop.eup %2375  ;;  %v728_v0 = vmul.f32 %v2374_v62, %v696_v32  ;;  %v743_v7 = vadd.f32 %v742_v2, %v735_v1 }
 0x170   : > { %v729_v3 = vmul.f32 %v2376_v63, %v697_v25 }
 0x171   : > { %v736_v4 = vmul.f32 %v734_v60, %v728_v0 }
 0x172   : > { %v2378_v5 = vpop.eup %2377  ;;  %v737_v9 = vmul.f32 %v734_v60, %v729_v3 }
 0x173   : > { %v730_v6 = vmul.f32 %v2378_v5, %v698_v33  ;;  %v744_v8 = vadd.f32 %v742_v2, %v736_v4 }
 0x174   : > { %v745_v15 = vadd.f32 %v742_v2, %v737_v9 }
 0x175   : > { %v747_v10 = vpack.c.bf16 %v744_v8, %v743_v7  ;;  %v738_v11 = vmul.f32 %v734_v60, %v730_v6 }
 0x177   : > { %2190 = vmatprep.mubr.msk.bf16.mxu0 %vm677_vm1, %v747_v10  ;;  %v746_v16 = vadd.f32 %v742_v2, %v738_v11 }
 0x179   : > { %v748_v18 = vpack.c.bf16 %v746_v16, %v745_v15 }
 0x17b   : > { %2191 = vmatmul.mubr.msk.bf16.vlgmr.msra.gmra.mrb[0].mxu0 %vm677_vm1, %v748_v18 }
 0x24e   : > { %v2192_v20 = vpop.f32.mrb[0].mxu0 }
 0x24f   : > { %v821_v21 = vadd.f32 %v2192_v20, %v2064_v19  ;;  %v812_v22 = vpop.f32.mrb[1].mxu0 }
 0x250   : > { %v813_v23 = vadd.f32 %v2064_v19, %v812_v22  ;;  %v2193_v24 = vpop.f32.mrb[2].mxu0 }
 0x251   : > { %v824_v25 = vadd.f32 %v2193_v24, %v2064_v19  ;;  %v815_v26 = vpop.f32.mrb[3].mxu0  ;;  %v829_v28 = vmul.f32 0.25, %v821_v21 }
 0x252   : > { %v816_v27 = vadd.f32 %v2064_v19, %v815_v26  ;;  %v827_v31 = vmul.f32 0.25, %v813_v23 }
 0x253   : > { %v830_v29 = vmul.f32 0.25, %v824_v25  ;;  %v2699_v30 = vpack.c.bf16 %v824_v25, %v821_v21 }
 0x254   : > { %v828_v32 = vmul.f32 0.25, %v816_v27  ;;  %v2701_v33 = vpack.c.bf16 %v816_v27, %v813_v23 }
 0x255   : > { %v832_v34 = vpack.c.bf16 %v830_v29, %v829_v28  ;;  %839 = vrot.lane.b32.xlu1 %v2699_v30, %s2467_s26 }
 0x256   : > { %v831_v35 = vpack.c.bf16 %v828_v32, %v827_v31  ;;  %837 = vrot.lane.b32.xlu0 %v2701_v33, %s2467_s26 }
 0x258   : > { %2198 = vmatprep.mubr.msk.bf16.mxu0 %vm841_vm2, %v831_v35 }
 0x2c7   : > { %v840_v38 = vpop.permute.xlu1 %839 }
 0x2c8   : > { %v838_v36 = vpop.permute.xlu0 %837  ;;  %v852_v39 = vsel %vm841_vm2, %v840_v38, 0 }
 0x2c9   : > { %v849_v37 = vsel %vm841_vm2, %v838_v36, 0  ;;  %2294 = vmatprep.subr.msk.bf16.mxu0 %vm841_vm2, %v838_v36 }
 0x2ca   : > { %2195 = vmatpush3.bf16.xpose.msra.mxu0 %v849_v37 }
 0x2cb   : > { %2295 = vmatprep.subr.msk.bf16.mxu0 %vm841_vm2, %v840_v38 }
 0x2d2   : > { %2197 = vmatpush3.bf16.xpose.msra.mxu0 %v852_v39 }
 0x2d9   : > { %2199 = vmatmul.mubr.msk.bf16.vlgmr.msra.gmra.mrb[4].mxu0 %vm841_vm2, %v832_v34 }
 0x3ac   : > { %v2200_v40 = vpop.f32.mrb[4].mxu0 }
 0x3ad   : > { %v888_v41 = vpop.f32.mrb[5].mxu0  ;;  %v909_v47 = vsel %vm677_vm1, %v2200_v40, -inf }
 0x3ae   : > { %v2201_v42 = vpop.f32.mrb[6].mxu0  ;;  %v903_v43 = vsel %vm677_vm1, %v888_v41, -inf }
 0x3af   : > { %904 = vmax.xlane.f32.xlu1 %v903_v43  ;;  %v891_v44 = vpop.f32.mrb[7].mxu0  ;;  %v912_v46 = vsel %vm677_vm1, %v2201_v42, -inf }
 0x3b0   : > { %v906_v45 = vsel %vm677_vm1, %v891_v44, -inf }
 0x3b1   : > { %907 = vmax.xlane.f32.xlu0 %v906_v45 }
 0x3b3   : > { %913 = vmax.xlane.f32.xlu1 %v912_v46 }
 0x3b5   : > { %910 = vmax.xlane.f32.xlu0 %v909_v47 }
 0x3c4   : > { %951 = vrot.lane.b32.xlu1 %v2699_v30, %s2468_s28 }
 0x43c   : > { %v905_v48 = vpop.xlane.xlu1 %904 }
 0x43d   : > { %v915_v52 = vsub.f32 %v888_v41, %v905_v48 }
 0x43e   : > { %v908_v49 = vpop.xlane.xlu0 %907 }
 0x43f   : > { %v916_v50 = vsub.f32 %v891_v44, %v908_v49  ;;  %v919_v60 = vmul.f32 1.442695, %v915_v52 }
 0x440   : > { %v914_v51 = vpop.xlane.xlu1 %913 }
 0x441   : > { %v918_v54 = vsub.f32 %v2201_v42, %v914_v51  ;;  %v921_v55 = vmul.f32 1.442695, %v916_v50 }
 0x442   : > { %v911_v57 = vpop.xlane.xlu0 %910 }
 0x443   : > { %v925_v58 = vmul.f32 1.442695, %v918_v54  ;;  %v917_v59 = vsub.f32 %v2200_v40, %v911_v57 }
 0x444   : > { %v952_v7 = vpop.permute.xlu1 %951 }
 0x445   : > { %2379 = vpow2.f32 %v925_v58  ;;  %v923_v62 = vmul.f32 1.442695, %v917_v59 }
 0x446   : > { %2381 = vpow2.f32 %v921_v55 }
 0x447   : > { %2383 = vpow2.f32 %v923_v62 }
 0x448   : > { %2385 = vpow2.f32 %v919_v60 }
 0x44f   : > { %v2380_v63 = vpop.eup %2379 }
 0x450   : > { %v2382_v0 = vpop.eup %2381  ;;  %v936_v1 = vsel %vm677_vm1, %v2380_v63, 0.0 }
 0x451   : > { %v2384_v2 = vpop.eup %2383  ;;  %937 = vadd.xlane.f32.xlu1 %v936_v1  ;;  %v930_v5 = vsel %vm677_vm1, %v2382_v0, 0.0 }
 0x452   : > { %v933_v3 = vsel %vm677_vm1, %v2384_v2, 0.0  ;;  %v2386_v4 = vpop.eup %2385 }
 0x453   : > { %934 = vadd.xlane.f32.xlu0 %v933_v3  ;;  %v927_v6 = vsel %vm677_vm1, %v2386_v4, 0.0 }
 0x455   : > { %931 = vadd.xlane.f32.xlu1 %v930_v5 }
 0x457   : > { %928 = vadd.xlane.f32.xlu0 %v927_v6 }
 0x466   : > { %1016 = vrot.lane.b32.xlu1 %v2701_v33, %s2469_s18 }
 0x46a   : > { %1018 = vrot.lane.b32.xlu1 %v2699_v30, %s2469_s18 }
 0x46d   : > { %949 = vrot.lane.b32.xlu0 %v2701_v33, %s2468_s28 }
 0x46e   : > { %1014 = vrot.lane.b32.xlu1 %v832_v34, %s2470_s16 }
 0x471   : > { %1012 = vrot.lane.b32.xlu0 %v831_v35, %s2470_s16 }
 0x4de   : > { %v938_v8 = vpop.xlane.xlu1 %937 }
 0x4e0   : > { %v935_v9 = vpop.xlane.xlu0 %934 }
 0x4e1   : > { %2387 = vrcp.f32 %v935_v9 }
 0x4e2   : > { %v932_v10 = vpop.xlane.xlu1 %931 }
 0x4e3   : > { %2389 = vrcp.f32 %v932_v10 }
 0x4e4   : > { %2391 = vrcp.f32 %v938_v8  ;;  %v929_v11 = vpop.xlane.xlu0 %928 }
 0x4e5   : > { %2393 = vrcp.f32 %v929_v11 }
 0x4e6   : > { %v1017_v20 = vpop.permute.xlu1 %1016 }
 0x4e7   : > { %v1027_v29 = vsel %vm841_vm2, %v1017_v20, 0 }
 0x4e8   : > { %v950_v15 = vpop.permute.xlu0 %949 }
 0x4e9   : > { %2202 = vmatprep.subr.bf16.mxu0 %v950_v15 }
 0x4ea   : > { %2203 = vmatpush3.bf16.msra.mxu0 %v950_v15  ;;  %v1019_v31 = vpop.permute.xlu1 %1018 }
 0x4eb   : > { %2204 = vmatprep.subr.bf16.mxu0 %v952_v7  ;;  %v2388_v16 = vpop.eup %2387  ;;  %v1030_v32 = vsel %vm841_vm2, %v1019_v31, 0 }
 0x4ec   : > { %v945_v22 = vmul.f32 %v2388_v16, %v2384_v2  ;;  %v1013_v28 = vpop.permute.xlu0 %1012 }
 0x4ed   : > { %v2390_v18 = vpop.eup %2389 }
 0x4ee   : > { %v2392_v19 = vpop.eup %2391  ;;  %2205 = vmatpush3.bf16.msra.mxu0 %v952_v7  ;;  %v944_v24 = vmul.f32 %v2390_v18, %v2382_v0  ;;  %v1015_v34 = vpop.permute.xlu1 %1014 }
 0x4ef   : > { %v2394_v21 = vpop.eup %2393  ;;  %2296 = vmatprep.subr.msk.bf16.mxu0 %vm841_vm2, %v1017_v20  ;;  %v946_v25 = vmul.f32 %v2392_v19, %v2380_v63 }
 0x4f0   : > { %v943_v23 = vmul.f32 %v2394_v21, %v2386_v4 }
 0x4f1   : > { %v948_v27 = vpack.c.bf16 %v946_v25, %v945_v22  ;;  %v2360_v25 = vld [vmem:[%s2609_s21 + $0x8] sm:$0xff]  }
 0x4f2   : > { %v947_v26 = vpack.c.bf16 %v944_v24, %v943_v23  ;;  %v2359_v24 = vld [vmem:[%s2609_s21] sm:$0xff]  }
 0x4f4   : > { %2206 = vmatprep.mubr.msk.bf16.mxu0 %vm677_vm1, %v947_v26 }
 0x4f5   : > { %2207 = vmatmul.mubr.msk.bf16.vlgmr.msra.gmra.mrb[8].mxu0 %vm677_vm1, %v948_v27 }
 0x4f6   : > { %2214 = vmatprep.mubr.msk.bf16.mxu0 %vm841_vm2, %v1013_v28 }
 0x4f7   : > { %2211 = vmatpush3.bf16.xpose.msra.mxu0 %v1027_v29 }
 0x4f8   : > { %2297 = vmatprep.subr.msk.bf16.mxu0 %vm841_vm2, %v1019_v31 }
 0x4ff   : > { %2213 = vmatpush3.bf16.xpose.msra.mxu0 %v1030_v32 }
 0x506   : > { %2215 = vmatmul.mubr.msk.bf16.vlgmr.msra.gmra.mrb[12].mxu0 %vm841_vm2, %v1015_v34 }
 0x5c8   : > { %v2733_v35 = vpop.f32.mrb[8].mxu0 }
 0x5c9   : > { %v2735_v36 = vpop.f32.mrb[9].mxu0 }
 0x5ca   : > { %v2737_v37 = vpop.f32.mrb[10].mxu0 }
 0x5cb   : > { %v2739_v38 = vpop.f32.mrb[11].mxu0 }
 0x5d9   : > { %v2216_v39 = vpop.f32.mrb[12].mxu0 }
 0x5da   : > { %v1066_v40 = vpop.f32.mrb[13].mxu0  ;;  %v1087_v45 = vsel %vm677_vm1, %v2216_v39, -inf }
 0x5db   : > { %v2217_v41 = vpop.f32.mrb[14].mxu0  ;;  %v1081_v42 = vsel %vm677_vm1, %v1066_v40, -inf }
 0x5dc   : > { %1082 = vmax.xlane.f32.xlu0 %v1081_v42  ;;  %v1069_v43 = vpop.f32.mrb[15].mxu0  ;;  %v1090_v46 = vsel %vm677_vm1, %v2217_v41, -inf }
 0x5dd   : > { %v1084_v44 = vsel %vm677_vm1, %v1069_v43, -inf }
 0x5de   : > { %1085 = vmax.xlane.f32.xlu1 %v1084_v44 }
 0x5e0   : > { %1088 = vmax.xlane.f32.xlu0 %v1087_v45 }
 0x5e4   : > { %1091 = vmax.xlane.f32.xlu0 %v1090_v46 }
 0x669   : > { %v1083_v47 = vpop.xlane.xlu0 %1082 }
 0x66a   : > { %v1093_v48 = vsub.f32 %v1066_v40, %v1083_v47 }
 0x66b   : > { %v1086_v49 = vpop.xlane.xlu1 %1085 }
 0x66c   : > { %v1097_v52 = vmul.f32 1.442695, %v1093_v48  ;;  %v1094_v54 = vsub.f32 %v1069_v43, %v1086_v49 }
 0x66d   : > { %v1089_v50 = vpop.xlane.xlu0 %1088 }
 0x66e   : > { %v1095_v51 = vsub.f32 %v2216_v39, %v1089_v50  ;;  %v1099_v59 = vmul.f32 1.442695, %v1094_v54 }
 0x670   : > { %v1101_v55 = vmul.f32 1.442695, %v1095_v51 }
 0x671   : > { %v1092_v57 = vpop.xlane.xlu0 %1091 }
 0x672   : > { %2395 = vpow2.f32 %v1101_v55  ;;  %v1096_v58 = vsub.f32 %v2217_v41, %v1092_v57 }
 0x673   : > { %2397 = vpow2.f32 %v1097_v52 }
 0x674   : > { %v1103_v60 = vmul.f32 1.442695, %v1096_v58 }
 0x676   : > { %2399 = vpow2.f32 %v1103_v60 }
 0x677   : > { %2401 = vpow2.f32 %v1099_v59 }
 0x67c   : > { %v2396_v62 = vpop.eup %2395 }
 0x67d   : > { %v1111_v63 = vsel %vm677_vm1, %v2396_v62, 0.0  ;;  %v2398_v0 = vpop.eup %2397 }
 0x67e   : > { %1112 = vadd.xlane.f32.xlu0 %v1111_v63  ;;  %v1105_v2 = vsel %vm677_vm1, %v2398_v0, 0.0 }
 0x680   : > { %v2400_v1 = vpop.eup %2399 }
 0x681   : > { %v1114_v3 = vsel %vm677_vm1, %v2400_v1, 0.0  ;;  %v2402_v4 = vpop.eup %2401 }
 0x682   : > { %1106 = vadd.xlane.f32.xlu0 %v1105_v2  ;;  %1115 = vadd.xlane.f32.xlu1 %v1114_v3  ;;  %v1108_v5 = vsel %vm677_vm1, %v2402_v4, 0.0 }
 0x686   : > { %1109 = vadd.xlane.f32.xlu1 %v1108_v5 }
 0x697   : > { %1129 = vrot.lane.b32.xlu1 %v2699_v30, %s2471_s12 }
 0x698   : > { %1127 = vrot.lane.b32.xlu0 %v2701_v33, %s2471_s12 }
 0x70b   : > { %v1113_v6 = vpop.xlane.xlu0 %1112 }
 0x70f   : > { %v1107_v7 = vpop.xlane.xlu0 %1106  ;;  %v1116_v8 = vpop.xlane.xlu1 %1115 }
 0x710   : > { %2403 = vrcp.f32 %v1116_v8 }
 0x711   : > { %2405 = vrcp.f32 %v1107_v7 }
 0x712   : > { %2407 = vrcp.f32 %v1113_v6 }
 0x713   : > { %v1128_v9 = vpop.permute.xlu0 %1127  ;;  %v1110_v10 = vpop.xlane.xlu1 %1109 }
 0x714   : > { %2409 = vrcp.f32 %v1110_v10  ;;  %2218 = vmatprep.subr.bf16.mxu1 %v1128_v9 }
 0x715   : > { %2219 = vmatpush3.bf16.msra.mxu1 %v1128_v9 }
 0x717   : > { %v1130_v11 = vpop.permute.xlu1 %1129 }
 0x718   : > { %2220 = vmatprep.subr.bf16.mxu1 %v1130_v11 }
 0x719   : > { %2221 = vmatpush3.bf16.msra.mxu1 %v1130_v11 }
 0x71a   : > { %v2404_v15 = vpop.eup %2403  ;;  %2226 = vmatprep.subr.bf16.mxu1 %v2359_v24 }
 0x71b   : > { %v2406_v30 = vpop.eup %2405  ;;  %v1124_v18 = vmul.f32 %v2404_v15, %v2400_v1 }
 0x71c   : > { %v2408_v16 = vpop.eup %2407  ;;  %v1121_v19 = vmul.f32 %v2406_v30, %v2398_v0 }
 0x71d   : > { %v1123_v21 = vmul.f32 %v2408_v16, %v2396_v62 }
 0x71e   : > { %v2410_v33 = vpop.eup %2409 }
 0x71f   : > { %v1122_v20 = vmul.f32 %v2410_v33, %v2402_v4  ;;  %v1126_v23 = vpack.c.bf16 %v1124_v18, %v1123_v21  ;;  %v2362_v21 = vld [vmem:[%s2623_s3 + $0x8] sm:$0xff]  }
 0x721   : > { %v1125_v22 = vpack.c.bf16 %v1122_v20, %v1121_v19  ;;  %v2361_v20 = vld [vmem:[%s2623_s3] sm:$0xff]  }
 0x722   : > { %2234 = vmatprep.subr.bf16.mxu0 %v2361_v20 }
 0x723   : > { %2222 = vmatprep.mubr.msk.bf16.mxu1 %vm677_vm1, %v1125_v22  ;;  %2235 = vmatpush3.bf16.msra.mxu0 %v2361_v20  ;;  %v2363_v22 = vld [vmem:[%s2633_s23] sm:$0xff]  }
 0x724   : > { %2223 = vmatmul.mubr.msk.bf16.vlgmr.msra.gmra.mrb[0].mxu1 %vm677_vm1, %v1126_v23  ;;  %2236 = vmatprep.subr.bf16.mxu0 %v2362_v21  ;;  %v2364_v23 = vld [vmem:[%s2633_s23 + $0x8] sm:$0xff]  }
 0x725   : > { %2227 = vmatpush3.bf16.msra.mxu1 %v2359_v24  ;;  %v2365_v24 = vld [vmem:[%s2633_s23 + $0x10] sm:$0xff]  }
 0x726   : > { %2228 = vmatprep.subr.bf16.mxu1 %v2360_v25 }
 0x727   : > { %2237 = vmatpush3.bf16.msra.mxu0 %v2362_v21 }
 0x729   : > { %2229 = vmatpush3.bf16.msra.mxu1 %v2360_v25  ;;  %v2366_v25 = vld [vmem:[%s2633_s23 + $0x18] sm:$0xff]  }
 0x72a   : > { %2242 = vmatprep.subr.bf16.mxu1 %v2363_v22 }
 0x7f7   : > { %v2224_v26 = vpop.f32.mrb[0].mxu1 }
 0x7f8   : > { %v1173_v27 = vpop.f32.mrb[1].mxu1 }
 0x7f9   : > { %v2225_v28 = vpop.f32.mrb[2].mxu1 }
 0x7fa   : > { %v2352_v29 = vpack.i.bf16 %v2225_v28, %v2224_v26  ;;  %v1176_v31 = vpop.f32.mrb[3].mxu1  ;;  %v2367_v26 = vld [vmem:[%s2633_s23 + $0x20] sm:$0xff]  }
 0x7fb   : > { %v2347_v32 = vpack.i.bf16 %v1176_v31, %v1173_v27  ;;  %v2368_v27 = vld [vmem:[%s2633_s23 + $0x28] sm:$0xff]  }
 0x7fd   : > { %2348 = vrot.lane.b32.xlu1 %v2347_v32, %s2472_s5 }
 0x801   : > { %2353 = vrot.lane.b32.xlu1 %v2352_v29, %s2472_s5 }
 0x86f   : > { %v2349_v34 = vpop.permute.xlu1 %2348 }
 0x870   : > { %v2351_v39 = vunpack.i.h.bf16 %v2349_v34  ;;  %v2350_v40 = vunpack.i.l.bf16 %v2349_v34 }
 0x872   : > { %v1205_v41 = vsel %vm841_vm2, %v2739_v38, %v2351_v39  ;;  %v1204_v42 = vsel %vm841_vm2, %v2735_v36, %v2350_v40  ;;  %v2077_v36 = vld [vmem:[%s2952_s27] ss:$0 sm:$0xff] }
 0x873   : > { %v1208_v43 = vpack.c.bf16 %v1205_v41, %v1204_v42  ;;  %v2354_v44 = vpop.permute.xlu1 %2353 }
 0x874   : > { %v2356_v45 = vunpack.i.h.bf16 %v2354_v44  ;;  %v2355_v46 = vunpack.i.l.bf16 %v2354_v44 }
 0x875   : > { %2230 = vmatprep.mubr.msk.bf16.mxu1 %vm677_vm1, %v1208_v43 }
 0x876   : > { %v1207_v47 = vsel %vm841_vm2, %v2737_v37, %v2356_v45  ;;  %v1206_v48 = vsel %vm841_vm2, %v2733_v35, %v2355_v46  ;;  %v1292_v45 = vld [vmem:[%s2618_s2] sm:$0x3] }
 0x877   : > { %v1209_v49 = vpack.c.bf16 %v1207_v47, %v1206_v48  ;;  %v1348_v47 = vrot.slane %v1292_v45, %v733_v56 }
 0x879   : > { %2231 = vmatmul.mubr.msk.bf16.vlgmr.msra.gmra.mrb[4].mxu1 %vm677_vm1, %v1209_v49  ;;  %v1356_v49 = vrot.slane %v1292_v45, %v741_v61  ;;  %v2425_v45 = vld [vmem:[%s2954_s22 + $0x20] sm:$0xff] (!%p2096_p8)  }
 0x87a   : > { %2243 = vmatpush3.bf16.msra.mxu1 %v2363_v22 }
 0x87b   : > { %2244 = vmatprep.subr.bf16.mxu1 %v2364_v23 }
 0x87e   : > { %2245 = vmatpush3.bf16.msra.mxu1 %v2364_v23 }
 0x87f   : > { %2246 = vmatprep.subr.bf16.mxu1 %v2365_v24 }
 0x882   : > { %2247 = vmatpush3.bf16.msra.mxu1 %v2365_v24 }
 0x883   : > { %2248 = vmatprep.subr.bf16.mxu1 %v2366_v25 }
 0x886   : > { %2249 = vmatpush3.bf16.msra.mxu1 %v2366_v25 }
 0x887   : > { %2250 = vmatprep.subr.bf16.mxu1 %v2367_v26 }
 0x88a   : > { %2251 = vmatpush3.bf16.msra.mxu1 %v2367_v26 }
 0x88b   : > { %2252 = vmatprep.subr.bf16.mxu1 %v2368_v27 }
 0x88e   : > { %2253 = vmatpush3.bf16.msra.mxu1 %v2368_v27 }
 0x94c   : > { %v2232_v38 = vpop.f32.mrb[4].mxu1 }
 0x94d   : > { %v1273_v50 = vpop.f32.mrb[5].mxu1  ;;  %v1282_v51 = vadd.f32 %v2232_v38, %v2077_v36 }
 0x94e   : > { %v1274_v52 = vadd.f32 %v2077_v36, %v1273_v50  ;;  %v2233_v54 = vpop.f32.mrb[6].mxu1 }
 0x94f   : > { %v1276_v55 = vpop.f32.mrb[7].mxu1  ;;  %v2774_v35 = vadd.f32 %v1282_v51, %v2659_v13  ;;  %v1285_v58 = vadd.f32 %v2233_v54, %v2077_v36 }
 0x950   : > { %v2771_v57 = vadd.f32 %v1274_v52, %v2657_v12  ;;  %v1277_v37 = vadd.f32 %v2077_v36, %v1276_v55 }
 0x951   : > { %v2784_v63 = vadd.f32 %v1285_v58, %v2667_v17  ;;  %v1299_v12 = vsel %vm677_vm1, %v2774_v35, 0.0 }
 0x952   : > { %v2777_v59 = vadd.f32 %v1277_v37, %v2661_v14  ;;  %v1293_v60 = vsel %vm677_vm1, %v2771_v57, 0.0 }
 0x953   : > { %1294 = vadd.xlane.f32.xlu0 %v1293_v60  ;;  %v1302_v13 = vsel %vm677_vm1, %v2784_v63, 0.0 }
 0x954   : > { %v1296_v62 = vsel %vm677_vm1, %v2777_v59, 0.0 }
 0x955   : > { %1297 = vadd.xlane.f32.xlu1 %v1296_v62 }
 0x957   : > { %1300 = vadd.xlane.f32.xlu0 %v1299_v12 }
 0x95b   : > { %1303 = vadd.xlane.f32.xlu0 %v1302_v13 }
 0x9e0   : > { %v1295_v14 = vpop.xlane.xlu0 %1294 }
 0x9e1   : > { %v1305_v0 = vmul.f32 0.03125, %v1295_v14 }
 0x9e2   : > { %v1298_v1 = vpop.xlane.xlu1 %1297 }
 0x9e3   : > { %v2791_v2 = vsub.f32 %v2771_v57, %v1305_v0  ;;  %v1306_v3 = vmul.f32 0.03125, %v1298_v1  ;;  %v2369_v0 = vld [vmem:[%s2633_s23 + $0x30] sm:$0xff]   ;;  %v2370_v1 = vld [vmem:[%s2633_s23 + $0x38] sm:$0xff]  }
 0x9e4   : > { %v1301_v4 = vpop.xlane.xlu0 %1300  ;;  %2254 = vmatprep.subr.bf16.mxu1 %v2369_v0 }
 0x9e5   : > { %v2794_v5 = vsub.f32 %v2777_v59, %v1306_v3  ;;  %v1307_v17 = vmul.f32 0.03125, %v1301_v4  ;;  %v1313_v6 = vmul.f32 %v2791_v2, %v2791_v2  ;;  %2255 = vmatpush3.bf16.msra.mxu1 %v2369_v0 }
 0x9e6   : > { %2256 = vmatprep.subr.bf16.mxu1 %v2370_v1 }
 0x9e7   : > { %v2799_v7 = vsub.f32 %v2774_v35, %v1307_v17  ;;  %v1317_v8 = vsel %vm677_vm1, %v1313_v6, 0.0  ;;  %v1314_v9 = vmul.f32 %v2794_v5, %v2794_v5 }
 0x9e8   : > { %1318 = vadd.xlane.f32.xlu0 %v1317_v8  ;;  %v1304_v10 = vpop.xlane.xlu0 %1303 }
 0x9e9   : > { %v1308_v11 = vmul.f32 0.03125, %v1304_v10  ;;  %v1320_v15 = vsel %vm677_vm1, %v1314_v9, 0.0  ;;  %v1315_v30 = vmul.f32 %v2799_v7, %v2799_v7  ;;  %2257 = vmatpush3.bf16.msra.mxu1 %v2370_v1 }
 0x9ea   : > { %1321 = vadd.xlane.f32.xlu1 %v1320_v15 }
 0x9eb   : > { %v1312_v16 = vsub.f32 %v2784_v63, %v1308_v11  ;;  %v1323_v33 = vsel %vm677_vm1, %v1315_v30, 0.0 }
 0x9ec   : > { %1324 = vadd.xlane.f32.xlu0 %v1323_v33 }
 0x9ed   : > { %v1316_v18 = vmul.f32 %v1312_v16, %v1312_v16 }
 0x9ef   : > { %v1326_v19 = vsel %vm677_vm1, %v1316_v18, 0.0  ;;  %v2087_v18 = vld [vmem:[%s644_s0] ss:$0 sm:$0xff] }
 0x9f0   : > { %1327 = vadd.xlane.f32.xlu1 %v1326_v19 }
 0xa75   : > { %v1319_v28 = vpop.xlane.xlu0 %1318 }
 0xa76   : > { %v1329_v29 = vmul.f32 0.03125, %v1319_v28 }
 0xa77   : > { %v1322_v31 = vpop.xlane.xlu1 %1321 }
 0xa78   : > { %v1333_v32 = vadd.f32 1e-05, %v1329_v29  ;;  %v1330_v34 = vmul.f32 0.03125, %v1322_v31 }
 0xa79   : > { %v1325_v39 = vpop.xlane.xlu0 %1324 }
 0xa7a   : > { %2411 = vrsqrt.f32 %v1333_v32  ;;  %v1334_v40 = vadd.f32 1e-05, %v1330_v34  ;;  %v1331_v41 = vmul.f32 0.03125, %v1325_v39  ;;  %v2423_v34 = vld [vmem:[%s2954_s22] sm:$0xff] (!%p2096_p8)   ;;  %v2421_v39 = vld [vmem:[%s2954_s22 + $0x30] sm:$0xff] (!%p2096_p8)  }
 0xa7c   : > { %2413 = vrsqrt.f32 %v1334_v40  ;;  %v1335_v42 = vadd.f32 1e-05, %v1331_v41  ;;  %v2424_v40 = vld [vmem:[%s2954_s22 + $0x8] sm:$0xff] (!%p2096_p8)  }
 0xa7d   : > { %v1328_v43 = vpop.xlane.xlu1 %1327 }
 0xa7e   : > { %2415 = vrsqrt.f32 %v1335_v42  ;;  %v1332_v44 = vmul.f32 0.03125, %v1328_v43  ;;  %v2422_v42 = vld [vmem:[%s2954_s22 + $0x38] sm:$0xff] (!%p2096_p8)  }
 0xa80   : > { %v1336_v46 = vadd.f32 1e-05, %v1332_v44 }
 0xa82   : > { %2417 = vrsqrt.f32 %v1336_v46 }
 0xa84   : > { %v2412_v48 = vpop.eup %2411 }
 0xa85   : > { %v1341_v36 = vmul.f32 %v2412_v48, %v2791_v2  ;;  %v2082_v2 = vld [vmem:[%s636_s1] ss:$0 sm:$0xff]  ;;  %s2475_s1 = smov (!%p2096_p8), 64  }
 0xa86   : > { %v2414_v38 = vpop.eup %2413 }
 0xa87   : > { %v1342_v50 = vmul.f32 %v2414_v38, %v2794_v5  ;;  %v1349_v51 = vmul.f32 %v1348_v47, %v1341_v36  ;;  %v2106_v36 = vld [vmem:[%s2955_s29 + $0x1] ss:$0 sm:$0xff] (!%p2096_p8) }
 0xa88   : > { %v2416_v52 = vpop.eup %2415 }
 0xa89   : > { %v1343_v54 = vmul.f32 %v2416_v52, %v2799_v7  ;;  %v1350_v55 = vmul.f32 %v1348_v47, %v1342_v50  ;;  %v1357_v37 = vadd.f32 %v1356_v49, %v1349_v51 }
 0xa8b   : > { %v1351_v58 = vmul.f32 %v1348_v47, %v1343_v54  ;;  %v1358_v60 = vadd.f32 %v1356_v49, %v1350_v55 }
 0xa8c   : > { %v2418_v56 = vpop.eup %2417 }
 0xa8d   : > { %v1344_v62 = vmul.f32 %v2418_v56, %v1312_v16  ;;  %v1361_v53 = vpack.c.bf16 %v1358_v60, %v1357_v37  ;;  %v1359_v61 = vadd.f32 %v1356_v49, %v1351_v58  ;;  %v2124_v37 = vld [vmem:[%s2956_s20 + $0x3] ss:$0 sm:$0xff] (!%p2096_p8) }
 0xa8f   : > { %v1352_v12 = vmul.f32 %v1348_v47, %v1344_v62  ;;  %2238 = vmatprep.mubr.msk.bf16.mxu0 %vm677_vm1, %v1361_v53  ;;  %v2426_v47 = vld [vmem:[%s2954_s22 + $0x28] sm:$0xff] (!%p2096_p8)  }
 0xa91   : > { %v1360_v13 = vadd.f32 %v1356_v49, %v1352_v12 }
 0xa93   : > { %v1362_v14 = vpack.c.bf16 %v1360_v13, %v1359_v61 }
 0xa95   : > { %2239 = vmatmul.mubr.msk.bf16.vlgmr.msra.gmra.mrb[16].mxu0 %vm677_vm1, %v1362_v14 }
 0xb68   : > { %v2240_v3 = vpop.f32.mrb[16].mxu0 }
 0xb69   : > { %v1435_v4 = vadd.f32 %v2240_v3, %v2082_v2  ;;  %v1426_v5 = vpop.f32.mrb[17].mxu0  ;;  %v2097_v3 = vld [vmem:[%s2956_s20] ss:$0 sm:$0xff] (!%p2096_p8) }
 0xb6a   : > { %v1427_v17 = vadd.f32 %v2082_v2, %v1426_v5  ;;  %v2241_v6 = vpop.f32.mrb[18].mxu0 }
 0xb6b   : > { %v1438_v7 = vadd.f32 %v2241_v6, %v2082_v2  ;;  %v1429_v8 = vpop.f32.mrb[19].mxu0  ;;  %v1443_v10 = vmax.f32 %v1435_v4, 0.0  ;;  %v2115_v6 = vld [vmem:[%s2956_s20 + $0x2] ss:$0 sm:$0xff] (!%p2096_p8) }
 0xb6c   : > { %v1430_v9 = vadd.f32 %v2082_v2, %v1429_v8  ;;  %v1441_v15 = vmax.f32 %v1427_v17, 0.0 }
 0xb6d   : > { %v1444_v11 = vmax.f32 %v1438_v7, 0.0 }
 0xb6e   : > { %v1442_v30 = vmax.f32 %v1430_v9, 0.0 }
 0xb6f   : > { %v1446_v16 = vpack.c.bf16 %v1444_v11, %v1443_v10 }
 0xb70   : > { %v1445_v33 = vpack.c.bf16 %v1442_v30, %v1441_v15 }
 0xb72   : > { %2258 = vmatprep.mubr.bf16.mxu1 %v1445_v33 }
 0xb73   : > { %2259 = vmatmul.mubr.bf16.vlgmr.msra.gmra.mrb[8].mxu1 %v1446_v16 }
 0xc46   : > { %v2260_v19 = vpop.f32.mrb[8].mxu1 }
 0xc47   : > { %v1561_v20 = vadd.f32 %v2260_v19, %v2087_v18  ;;  %v1552_v21 = vpop.f32.mrb[9].mxu1 }
 0xc48   : > { %v1553_v22 = vadd.f32 %v2087_v18, %v1552_v21  ;;  %v2261_v23 = vpop.f32.mrb[10].mxu1  ;;  %1578 = sbr.rel (%p2096_p8) target bundleno = 3499 (0xdab), region = 84 }
 0xc49   : > { %v1569_v24 = vadd.f32 %v1561_v20, %v2774_v35  ;;  %v1564_v25 = vadd.f32 %v2261_v23, %v2087_v18  ;;  %v1555_v26 = vpop.f32.mrb[11].mxu1  ;;  %v2473_v35 = vmov (!%p2096_p8), 0.0  }
 0xc4a   : > { %v1567_v27 = vadd.f32 %v1553_v22, %v2771_v57  ;;  %v1556_v28 = vadd.f32 %v2087_v18, %v1555_v26  ;;  %v2419_v57 = vld [vmem:[%s2954_s22 + $0x10] sm:$0xff] (!%p2096_p8)   ;;  %2270 = vmatprep.subr.bf16.mxu1 (!%p2096_p8), %v2473_v35  ;;  %2262 = vmatprep.subr.bf16.mxu0 (!%p2096_p8), %v2473_v35 }
 0xc4b   : > { %1573 = vst.msk [vmem:[#allocation2 + $0x10] sm:$0xff] %vm677_vm1, %v1569_v24  ;;  %v1570_v29 = vadd.f32 %v1564_v25, %v2784_v63  ;;  %v2420_v63 = vld [vmem:[%s2954_s22 + $0x18] sm:$0xff] (!%p2096_p8)   ;;  %2271 = vmatpush3.bf16.msra.mxu1 (!%p2096_p8), %v2419_v57  ;;  %2274 = vmatprep.mubr.msk.bf16.mxu1 (!%p2096_p8), %vm2474_vm3, %v2473_v35 }
 0xc4c   : > { %1571 = vst.msk [vmem:[#allocation2] sm:$0xff] %vm677_vm1, %v1567_v27  ;;  %v1568_v31 = vadd.f32 %v1556_v28, %v2777_v59  ;;  %2272 = vmatprep.subr.bf16.mxu1 (!%p2096_p8), %v2473_v35  ;;  %2266 = vmatprep.mubr.msk.bf16.mxu0 (!%p2096_p8), %vm2474_vm3, %v2473_v35 }
 0xc4d   : > { %1574 = vst.msk [vmem:[#allocation2 + $0x18] sm:$0xff] %vm677_vm1, %v1570_v29  ;;  %2263 = vmatpush3.bf16.msra.mxu0 (!%p2096_p8), %v2423_v34 }
 0xc4e   : > { %1572 = vst.msk [vmem:[#allocation2 + $0x8] sm:$0xff] %vm677_vm1, %v1568_v31  ;;  %2264 = vmatprep.subr.bf16.mxu0 (!%p2096_p8), %v2473_v35 }
 0xc4f   : > { %2273 = vmatpush3.bf16.msra.mxu1 %v2420_v63 }
 0xc50   : > { %2286 = vmatprep.subr.bf16.mxu1 %v2473_v35 }
 0xc51   : > { %2265 = vmatpush3.bf16.msra.mxu0 %v2424_v40 }
 0xc52   : > { %2278 = vmatprep.subr.bf16.mxu0 %v2473_v35  ;;  %v1581_v48 = vld [vmem:[#allocation2 + $0x10] sm:$0xff] }
 0xc53   : > { %v1579_v41 = vld [vmem:[#allocation2] sm:$0xff]  ;;  %v1585_v49 = vpack.c.bf16 %v1581_v48, %v1581_v48 }
 0xc54   : > { %v1582_v43 = vld [vmem:[#allocation2 + $0x18] sm:$0xff]  ;;  %v1583_v44 = vpack.c.bf16 %v1579_v41, %v1579_v41 }
 0xc55   : > { %v1580_v59 = vld [vmem:[#allocation2 + $0x8] sm:$0xff]  ;;  %v1586_v46 = vpack.c.bf16 %v1582_v43, %v1582_v43 }
 0xc56   : > { %v1584_v32 = vpack.c.bf16 %v1580_v59, %v1580_v59  ;;  %2267 = vmatmul.mubr.msk.bf16.vlgmr.msra.gmra.mrb[0].mxu0 %vm677_vm1, %v1583_v44 }
 0xc57   : > { %2279 = vmatpush3.bf16.msra.mxu0 %v2425_v45  ;;  %2282 = vmatprep.mubr.msk.bf16.mxu0 %vm2474_vm3, %v2473_v35 }
 0xc58   : > { %2275 = vmatmul.mubr.msk.bf16.vlgmr.msra.gmra.mrb[0].mxu1 %vm677_vm1, %v1584_v32  ;;  %2280 = vmatprep.subr.bf16.mxu0 %v2473_v35 }
 0xc59   : > { %2287 = vmatpush3.bf16.msra.mxu1 %v2421_v39  ;;  %2290 = vmatprep.mubr.msk.bf16.mxu1 %vm2474_vm3, %v2473_v35 }
 0xc5a   : > { %2288 = vmatprep.subr.bf16.mxu1 %v2473_v35 }
 0xc5b   : > { %2281 = vmatpush3.bf16.msra.mxu0 %v2426_v47 }
 0xc5d   : > { %2289 = vmatpush3.bf16.msra.mxu1 %v2422_v42 }
 0xc5e   : > { %2283 = vmatmul.mubr.msk.bf16.vlgmr.msra.gmra.mrb[4].mxu0 %vm677_vm1, %v1585_v49 }
 0xc60   : > { %2291 = vmatmul.mubr.msk.bf16.vlgmr.msra.gmra.mrb[4].mxu1 %vm677_vm1, %v1586_v46 }
 0xd29   : > { %v1647_v55 = vpop.f32.mrb[0].mxu0 }
 0xd2a   : > { %v2268_v58 = vpop.f32.mrb[1].mxu0  ;;  %v1648_v4 = vadd.f32 %v2097_v3, %v1647_v55 }
 0xd2b   : > { %v1715_v38 = vpop.f32.mrb[0].mxu1  ;;  %v1650_v60 = vpop.f32.mrb[2].mxu0 }
 0xd2c   : > { %v1716_v50 = vadd.f32 %v2106_v36, %v1715_v38  ;;  %v2276_v51 = vpop.f32.mrb[1].mxu1  ;;  %v2269_v62 = vpop.f32.mrb[3].mxu0 }
 0xd2d   : > { %v1718_v52 = vpop.f32.mrb[2].mxu1 }
 0xd2e   : > { %v2277_v54 = vpop.f32.mrb[3].mxu1  ;;  %1858 = vrot.lane.b32.xlu0 %v1716_v50, %s2475_s1 }
 0xd31   : > { %v1783_v14 = vpop.f32.mrb[4].mxu0 }
 0xd32   : > { %v2284_v0 = vpop.f32.mrb[5].mxu0  ;;  %v1784_v7 = vadd.f32 %v2115_v6, %v1783_v14 }
 0xd33   : > { %v1851_v56 = vpop.f32.mrb[4].mxu1  ;;  %v1786_v1 = vpop.f32.mrb[6].mxu0 }
 0xd34   : > { %v1852_v53 = vadd.f32 %v2124_v37, %v1851_v56  ;;  %v2292_v61 = vpop.f32.mrb[5].mxu1  ;;  %v2285_v2 = vpop.f32.mrb[7].mxu0 }
 0xd35   : > { %v1854_v12 = vpop.f32.mrb[6].mxu1 }
 0xd36   : > { %v2293_v13 = vpop.f32.mrb[7].mxu1  ;;  %1862 = vrot.lane.b32.xlu0 %v1852_v53, %s2475_s1 }
 0xda0   : > { %v1859_v5 = vpop.permute.xlu0 %1858 }
 0xda1   : > { %v1866_v17 = vsel %vm1865_vm4, %v1648_v4, %v1859_v5 }
 0xda2   : > { %1868 = vst [vmem:[%s2642_s15] sm:$0xff] %v1866_v17 }
 0xda8   : > { %v1863_v8 = vpop.permute.xlu0 %1862 }
 0xda9   : > { %v1867_v9 = vsel %vm1865_vm4, %v1784_v7, %v1863_v8 }
 0xdaa   : > { %1869 = vst [vmem:[%s2642_s15 + $0x8] sm:$0xff] %v1867_v9 }
 0xdab PF: > { %s2957_s28 = sld [smem:[#allocation6_spill]]  ;;  %s2958_s29 = sld [smem:[#allocation4_spill]] }
 0xdac   : > { %s2959_s30 = sld [smem:[#allocation5_spill]]  ;;  %s2960_s15 = sld [smem:[#allocation7_spill]] }
 0xdad   : > { %s2961_s16 = sld [smem:[#allocation8_spill]] }
 0xdb1   : > { %s24_s17 = sadd.s32 1, %s2957_s28  }
 0xdb2   : > { %p21_p9 = scmp.ge.s32.totalorder %s24_s17, 6  }
 0xdb4   :  { %23 = sbr.rel (!%p21_p9) target bundleno = 8 (0x8), region = 150 }

</bundles_post_ra>
